<compile_context>
chip_gen: v7x
topology: tpu7x:2x2x1
jax: 0.10.0
libtpu: 0.0.40
codegen_flags: <defaults>
</compile_context>

<pallas_src>
import jax
import jax.numpy as jnp
from jax.experimental import pallas as pl
from jax.experimental.pallas import tpu as pltpu


def se_gate_mul_kernel(w_ref, xse_ref, x_ref, o_ref):
    # w_ref:   (K, C_out) f32 — lane-major weight; row C_in holds the bias,
    #          remaining rows are zero padding (K = C_in+1 rounded up to 8).
    # xse_ref: (1, K) f32    — SE input row with a trailing 1.0 (bias) + zeros.
    # x_ref:   (C_out, H*W)  — main activation, passed through with no cast.
    w_t = jnp.transpose(w_ref[...])                              # (C_out, K), XLU
    s = jnp.sum(w_t * xse_ref[...], axis=-1, keepdims=True)      # VPU mul + lane reduce
    gate = jax.nn.sigmoid(s)                                     # EUP, (C_out, 1)

    x = x_ref[...]
    if x.dtype == jnp.float32:
        o_ref[...] = (gate * x).astype(o_ref.dtype)              # exact f32 path
    else:
        # bf16 fast path (v6e/v7x bf16 VALU): multiply natively, no f32 temp.
        o_ref[...] = (gate.astype(x.dtype) * x).astype(o_ref.dtype)


def se_gate_mul(x_se_nchw, x_main_nchw, weight, bias, *, donate_x_main=False):
    """x_se_nchw: [1, Cin, 1, 1]; x_main_nchw: [1, Cout, H, W];
    weight: [Cout, Cin, 1, 1]; bias: [Cout]."""
    _, c_in, _, _ = x_se_nchw.shape
    n, c_out, h, w = x_main_nchw.shape
    assert n == 1  # SE gate in efficientnet_b4 runs with batch folded elsewhere

    # Lane-major weight with bias folded in; sublane axis zero-padded to 8k.
    k_rows = ((c_in + 1 + 7) // 8) * 8
    w_aug = jnp.zeros((k_rows, c_out), jnp.float32)
    w_aug = w_aug.at[:c_in, :].set(weight.reshape(c_out, c_in).T.astype(jnp.float32))
    w_aug = w_aug.at[c_in, :].set(bias.astype(jnp.float32))

    xse_aug = jnp.zeros((1, k_rows), jnp.float32)
    xse_aug = xse_aug.at[0, :c_in].set(x_se_nchw.reshape(c_in).astype(jnp.float32))
    xse_aug = xse_aug.at[0, c_in].set(1.0)

    # Main tensor: free contiguous reshape NCHW -> (C, H*W); NO dtype cast so
    # bf16 activations pass straight through and halve HBM traffic.
    xmain = x_main_nchw.reshape(c_out, h * w)

    vmem = pl.BlockSpec(memory_space=pltpu.MemorySpace.VMEM)
    itemsize = jnp.dtype(xmain.dtype).itemsize
    cost = pl.CostEstimate(
        flops=int(2 * c_out * k_rows + 2 * c_out * h * w),
        transcendentals=int(c_out),
        bytes_accessed=int((w_aug.size + xse_aug.size) * 4
                           + 2 * xmain.size * itemsize),
    )

    out = pl.pallas_call(
        se_gate_mul_kernel,
        out_shape=jax.ShapeDtypeStruct((c_out, h * w), xmain.dtype),
        in_specs=[vmem, vmem, vmem],
        out_specs=vmem,
        cost_estimate=cost,
        # When the caller can donate x171, alias it onto the output so XLA does
        # not allocate a second 0.5 MB buffer or insert a defensive copy.
        input_output_aliases=({2: 0} if donate_x_main else {}),
    )(w_aug, xse_aug, xmain)

    return out.reshape(1, c_out, h, w)


if __name__ == "__main__":
    key = jax.random.PRNGKey(0)
    k1, k2, k3, k4 = jax.random.split(key, 4)

    C_IN, C_OUT, H, W = 28, 672, 14, 14

    # Deterministic synthetic parameters (shapes match Conv2d(28, 672, 1x1)).
    weight = jax.random.normal(k1, (C_OUT, C_IN, 1, 1), dtype=jnp.float32) * 0.1
    bias = jax.random.normal(k2, (C_OUT,), dtype=jnp.float32) * 0.1

    # Deterministic example inputs matching the module's forward signature.
    x174 = jax.random.normal(k3, (1, C_IN, 1, 1), dtype=jnp.float32)   # SE input
    x171 = jax.random.normal(k4, (1, C_OUT, H, W), dtype=jnp.float32)  # main tensor

    out = se_gate_mul(x174, x171, weight, bias)
    out = jax.block_until_ready(out)

    # Plain-JAX reference (exact f32 elementwise matvec) for a sanity check.
    gate_ref = jax.nn.sigmoid(
        (weight.reshape(C_OUT, C_IN) * x174.reshape(1, C_IN)).sum(axis=1) + bias
    ).reshape(1, C_OUT, 1, 1)
    ref = gate_ref * x171
    assert out.shape == (1, C_OUT, H, W)
    assert jnp.allclose(out, ref, atol=1e-5, rtol=1e-5)

    print("KERNEL_OK")
</pallas_src>

<mosaic_0001>
module attributes {stable_mosaic.version = 11 : i64} {
  func.func @se_gate_mul_kernel(%arg0: memref<32x672xf32, #tpu.memory_space<vmem>>, %arg1: memref<1x32xf32, #tpu.memory_space<vmem>>, %arg2: memref<672x196xf32, #tpu.memory_space<vmem>>, %arg3: memref<672x196xf32, #tpu.memory_space<vmem>>) attributes {dimension_semantics = [], scalar_prefetch = 0 : i64, scratch_operands = 0 : i64, tpu.core_type = #tpu.core_type<tc>} {
    %c0 = arith.constant 0 : index
    %c0_0 = arith.constant 0 : index
    %0 = vector.load %arg0[%c0, %c0_0] : memref<32x672xf32, #tpu.memory_space<vmem>>, vector<32x672xf32>
    %1 = tpu.transpose %0, [1, 0] : vector<32x672xf32> -> vector<672x32xf32>
    %c0_1 = arith.constant 0 : index
    %c0_2 = arith.constant 0 : index
    %2 = vector.load %arg1[%c0_1, %c0_2] : memref<1x32xf32, #tpu.memory_space<vmem>>, vector<1x32xf32>
    %3 = vector.broadcast %2 : vector<1x32xf32> to vector<672x32xf32>
    %4 = arith.mulf %1, %3 : vector<672x32xf32>
    %cst = arith.constant dense<0.000000e+00> : vector<672xf32>
    %5 = vector.multi_reduction <add>, %4, %cst [1] : vector<672x32xf32> to vector<672xf32>
    %6 = vector.shape_cast %5 : vector<672xf32> to vector<672x1xf32>
    %7 = arith.negf %6 : vector<672x1xf32>
    %8 = math.exp %7 : vector<672x1xf32>
    %cst_3 = arith.constant 1.000000e+00 : f32
    %9 = vector.broadcast %cst_3 : f32 to vector<672x1xf32>
    %10 = arith.addf %9, %8 : vector<672x1xf32>
    %11 = arith.divf %9, %10 : vector<672x1xf32>
    %c0_4 = arith.constant 0 : index
    %c0_5 = arith.constant 0 : index
    %12 = vector.load %arg2[%c0_4, %c0_5] : memref<672x196xf32, #tpu.memory_space<vmem>>, vector<672x196xf32>
    %13 = vector.broadcast %11 : vector<672x1xf32> to vector<672x196xf32>
    %14 = arith.mulf %13, %12 : vector<672x196xf32>
    %c0_6 = arith.constant 0 : index
    %c0_7 = arith.constant 0 : index
    %15 = vector.load %arg3[%c0_6, %c0_7] : memref<672x196xf32, #tpu.memory_space<vmem>>, vector<672x196xf32>
    tpu.vector_store %arg3[%c0_6, %c0_7], %14 {strides = array<i32>} : memref<672x196xf32, #tpu.memory_space<vmem>>, vector<672x196xf32>,
    return
  }
}

</mosaic_0001>

<bundles_post_ra>
// kernel: tpu_custom_call.1
= control target key start
LH: loop header
LB: loop body
LE: loop exit
PB: predicated region body
PF: predicated region fallthrough
CT: control target
= control target key end

     0   :  { %vm321_vm0 = vcmask 261120   ;;  %vm1415_vm1 = vcmask 556032   ;;  %s3564_s0 = inlined_call_operand.vmem [shape: f32[32,672], index: 0, kind: input, shape index: {}]   ;;  %s3565_s1 = inlined_call_operand.vmem [shape: f32[1,32], index: 1, kind: input, shape index: {}]   ;;  %s3566_s2 = inlined_call_operand.vmem [shape: f32[672,196], index: 2, kind: input, shape index: {}]   ;;  %s3567_s3 = inlined_call_operand.vmem [shape: f32[672,196], index: 3, kind: output, shape index: {}]  }
   0x1   :  { %v15_v0 = vld [vmem:[%s3564_s0 + $0x8] sm:$0xff]  ;;  %v14_v1 = vld [vmem:[%s3564_s0] sm:$0xff]  ;;  %v21_v2 = vld [vmem:[%s3564_s0 + $0x38] sm:$0xff] }
   0x2   :  { %70 = vxpose.xlu1.b32.start [1/4] (short) %v15_v0, 128  ;;  %38 = vxpose.xlu0.b32.start [1/4] (short) %v14_v1, 128  ;;  %v20_v3 = vld [vmem:[%s3564_s0 + $0x30] sm:$0xff]  ;;  %v27_v4 = vld [vmem:[%s3564_s0 + $0x68] sm:$0xff]  ;;  %v26_v5 = vld [vmem:[%s3564_s0 + $0x60] sm:$0xff] }
   0x3   :  { %v33_v6 = vld [vmem:[%s3564_s0 + $0x98] sm:$0xff]  ;;  %v32_v7 = vld [vmem:[%s3564_s0 + $0x90] sm:$0xff]  ;;  %v23_v10 = vld [vmem:[%s3564_s0 + $0x48] sm:$0xff] }
   0x4   :  { %v17_v8 = vld [vmem:[%s3564_s0 + $0x18] sm:$0xff]  ;;  %v16_v9 = vld [vmem:[%s3564_s0 + $0x10] sm:$0xff]  ;;  %v22_v11 = vld [vmem:[%s3564_s0 + $0x40] sm:$0xff] }
   0x5   :  { %v29_v12 = vld [vmem:[%s3564_s0 + $0x78] sm:$0xff]  ;;  %v28_v13 = vld [vmem:[%s3564_s0 + $0x70] sm:$0xff]  ;;  %v35_v14 = vld [vmem:[%s3564_s0 + $0xa8] sm:$0xff] }
   0x6   :  { %71 = vxpose.xlu1.b32.cont [2/4] (short) %v21_v2, 128  ;;  %39 = vxpose.xlu0.b32.cont [2/4] (short) %v20_v3, 128  ;;  %v34_v15 = vld [vmem:[%s3564_s0 + $0xa0] sm:$0xff]  ;;  %v19_v16 = vld [vmem:[%s3564_s0 + $0x28] sm:$0xff]  ;;  %v25_v18 = vld [vmem:[%s3564_s0 + $0x58] sm:$0xff] }
   0x7   :  { %v18_v17 = vld [vmem:[%s3564_s0 + $0x20] sm:$0xff]  ;;  %v24_v19 = vld [vmem:[%s3564_s0 + $0x50] sm:$0xff]  ;;  %v31_v20 = vld [vmem:[%s3564_s0 + $0x88] sm:$0xff] }
   0x8   :  { %v30_v21 = vld [vmem:[%s3564_s0 + $0x80] sm:$0xff]  ;;  %v37_v24 = vld [vmem:[%s3564_s0 + $0xb8] sm:$0xff]  ;;  %v36_v25 = vld [vmem:[%s3564_s0 + $0xb0] sm:$0xff] }
   0x9   :  { %v2126_v44 = vld [vmem:[%s3565_s1] ss:$0 sm:$0xff] }
   0xa   :  { %72 = vxpose.xlu1.b32.cont [3/4] (short) %v27_v4, 128  ;;  %40 = vxpose.xlu0.b32.cont [3/4] (short) %v26_v5, 128 }
   0xe   :  { %73 = vxpose.xlu1.b32.end [4/4] (short) %v33_v6, 128  ;;  %41 = vxpose.xlu0.b32.end [4/4] (short) %v32_v7, 128 }
  0x3f   :  { %134 = vxpose.xlu1.b32.start [1/4] (short) %v17_v8, 128  ;;  %102 = vxpose.xlu0.b32.start [1/4] (short) %v16_v9, 128 }
  0x43   :  { %135 = vxpose.xlu1.b32.cont [2/4] (short) %v23_v10, 128  ;;  %103 = vxpose.xlu0.b32.cont [2/4] (short) %v22_v11, 128 }
  0x47   :  { %136 = vxpose.xlu1.b32.cont [3/4] (short) %v29_v12, 128  ;;  %104 = vxpose.xlu0.b32.cont [3/4] (short) %v28_v13, 128 }
  0x4b   :  { %137 = vxpose.xlu1.b32.end [4/4] (short) %v35_v14, 128  ;;  %105 = vxpose.xlu0.b32.end [4/4] (short) %v34_v15, 128 }
  0x7c   :  { %198 = vxpose.xlu1.b32.start [1/4] (short) (narrow) %v19_v16, 32  ;;  %166 = vxpose.xlu0.b32.start [1/4] (short) %v18_v17, 128 }
  0x80   :  { %199 = vxpose.xlu1.b32.cont [2/4] (short) (narrow) %v25_v18, 32  ;;  %167 = vxpose.xlu0.b32.cont [2/4] (short) %v24_v19, 128 }
  0x82   :  { %v2095_v22 = vpop.trf.xlu0  ;;  %v2097_v23 = vpop.trf.xlu1 }
  0x84   :  { %200 = vxpose.xlu1.b32.cont [3/4] (short) (narrow) %v31_v20, 32  ;;  %168 = vxpose.xlu0.b32.cont [3/4] (short) %v30_v21, 128 }
  0x86   :  { %v55_v26 = vpop.trf.xlu0  ;;  %v2105_v27 = vpop.trf.xlu1 }
  0x87   :  { %v238_v45 = vmul.f32 %v2126_v44, %v55_v26 }
  0x88   :  { %201 = vxpose.xlu1.b32.end [4/4] (short) (narrow) %v37_v24, 32  ;;  %169 = vxpose.xlu0.b32.end [4/4] (short) %v36_v25, 128 }
  0x89   :  { %v325_v48 = vsel %vm321_vm0, %v238_v45, 0.0  ;;  %v237_v45 = vmul.f32 %v2126_v44, %v2095_v22  ;;  %v254_v22 = vmul.f32 %v2126_v44, %v2105_v27 }
  0x8a   :  { %v56_v28 = vpop.trf.xlu0  ;;  %v2107_v29 = vpop.trf.xlu1 }
  0x8b   :  { %v239_v49 = vmul.f32 %v2126_v44, %v56_v28 }
  0x8d   :  { %v328_v52 = vsel %vm321_vm0, %v239_v49, 0.0 }
  0x8e   :  { %v57_v30 = vpop.trf.xlu0  ;;  %v2109_v31 = vpop.trf.xlu1 }
  0x8f   :  { %v240_v53 = vmul.f32 %v2126_v44, %v57_v30 }
  0x91   :  { %v331_v56 = vsel %vm321_vm0, %v240_v53, 0.0  ;;  %v322_v53 = vsel %vm321_vm0, %v237_v45, 0.0 }
  0x92   :  { %v58_v32 = vpop.trf.xlu0  ;;  %v2111_v33 = vpop.trf.xlu1 }
  0x93   :  { %v241_v57 = vmul.f32 %v2126_v44, %v58_v32  ;;  %v257_v27 = vmul.f32 %v2126_v44, %v2111_v33 }
  0x95   :  { %v334_v60 = vsel %vm321_vm0, %v241_v57, 0.0  ;;  %v255_v57 = vmul.f32 %v2126_v44, %v2107_v29 }
  0x96   :  { %v59_v34 = vpop.trf.xlu0  ;;  %v2113_v35 = vpop.trf.xlu1 }
  0x97   :  { %v242_v61 = vmul.f32 %v2126_v44, %v59_v34  ;;  %v258_v29 = vmul.f32 %v2126_v44, %v2113_v35 }
  0x99   :  { %v337_v0 = vsel %vm321_vm0, %v242_v61, 0.0  ;;  %v373_v61 = vsel %vm321_vm0, %v254_v22, 0.0 }
  0x9a   :  { %v60_v36 = vpop.trf.xlu0  ;;  %v2115_v37 = vpop.trf.xlu1 }
  0x9b   :  { %v243_v1 = vmul.f32 %v2126_v44, %v60_v36 }
  0x9d   :  { %v340_v4 = vsel %vm321_vm0, %v243_v1, 0.0 }
  0x9e   :  { %v61_v38 = vpop.trf.xlu0  ;;  %v2117_v39 = vpop.trf.xlu1 }
  0x9f   :  { %v244_v5 = vmul.f32 %v2126_v44, %v61_v38  ;;  %v260_v33 = vmul.f32 %v2126_v44, %v2117_v39 }
  0xa1   :  { %v343_v7 = vsel %vm321_vm0, %v244_v5, 0.0  ;;  %v382_v5 = vsel %vm321_vm0, %v257_v27, 0.0 }
  0xa2   :  { %v62_v40 = vpop.trf.xlu0  ;;  %v2119_v41 = vpop.trf.xlu1 }
  0xa3   :  { %v245_v8 = vmul.f32 %v2126_v44, %v62_v40  ;;  %v261_v35 = vmul.f32 %v2126_v44, %v2119_v41 }
  0xa5   :  { %v346_v11 = vsel %vm321_vm0, %v245_v8, 0.0 }
  0xa6   :  { %v63_v42 = vpop.trf.xlu0  ;;  %v2121_v43 = vpop.trf.xlu1 }
  0xa7   :  { %v246_v12 = vmul.f32 %v2126_v44, %v63_v42 }
  0xa9   :  { %v349_v15 = vsel %vm321_vm0, %v246_v12, 0.0 }
  0xaa   :  { %v64_v46 = vpop.trf.xlu0  ;;  %v2129_v47 = vpop.trf.xlu1 }
  0xab   :  { %v247_v16 = vmul.f32 %v2126_v44, %v64_v46  ;;  %v263_v39 = vmul.f32 %v2126_v44, %v2129_v47 }
  0xad   :  { %v352_v18 = vsel %vm321_vm0, %v247_v16, 0.0 }
  0xae   :  { %v65_v50 = vpop.trf.xlu0  ;;  %v2133_v51 = vpop.trf.xlu1 }
  0xaf   :  { %326 = vadd.xlane.f32.xlu1 %v325_v48  ;;  %v248_v19 = vmul.f32 %v2126_v44, %v65_v50  ;;  %v264_v41 = vmul.f32 %v2126_v44, %v2133_v51 }
  0xb1   :  { %v355_v24 = vsel %vm321_vm0, %v248_v19, 0.0 }
  0xb2   :  { %v66_v54 = vpop.trf.xlu0  ;;  %v2137_v55 = vpop.trf.xlu1 }
  0xb3   :  { %329 = vadd.xlane.f32.xlu1 %v328_v52  ;;  %v249_v25 = vmul.f32 %v2126_v44, %v66_v54  ;;  %v253_v52 = vmul.f32 %v2126_v44, %v2097_v23  ;;  %v256_v23 = vmul.f32 %v2126_v44, %v2109_v31  ;;  %v259_v31 = vmul.f32 %v2126_v44, %v2115_v37 }
  0xb4   :  { %v262_v37 = vmul.f32 %v2126_v44, %v2121_v43  ;;  %v265_v43 = vmul.f32 %v2126_v44, %v2137_v55 }
  0xb5   :  { %v358_v30 = vsel %vm321_vm0, %v249_v25, 0.0  ;;  %v379_v1 = vsel %vm321_vm0, %v256_v23, 0.0 }
  0xb6   :  { %v67_v58 = vpop.trf.xlu0  ;;  %v2141_v59 = vpop.trf.xlu1  ;;  %v397_v19 = vsel %vm321_vm0, %v262_v37, 0.0 }
  0xb7   :  { %332 = vadd.xlane.f32.xlu1 %v331_v56  ;;  %v250_v32 = vmul.f32 %v2126_v44, %v67_v58  ;;  %v370_v58 = vsel %vm321_vm0, %v253_v52, 0.0  ;;  %v266_v47 = vmul.f32 %v2126_v44, %v2141_v59 }
  0xb9   :  { %v361_v36 = vsel %vm321_vm0, %v250_v32, 0.0  ;;  %v403_v32 = vsel %vm321_vm0, %v264_v41, 0.0 }
  0xba   :  { %v68_v62 = vpop.trf.xlu0  ;;  %v2145_v63 = vpop.trf.xlu1 }
  0xbb   :  { %335 = vadd.xlane.f32.xlu1 %v334_v60  ;;  %v251_v38 = vmul.f32 %v2126_v44, %v68_v62  ;;  %v267_v51 = vmul.f32 %v2126_v44, %v2145_v63 }
  0xbd   :  { %v364_v46 = vsel %vm321_vm0, %v251_v38, 0.0  ;;  %v406_v38 = vsel %vm321_vm0, %v265_v43, 0.0  ;;  %v412_v52 = vsel %vm321_vm0, %v267_v51, 0.0 }
  0xbe   :  { %v69_v2 = vpop.trf.xlu0  ;;  %v2149_v3 = vpop.trf.xlu1 }
  0xbf   :  { %338 = vadd.xlane.f32.xlu1 %v337_v0  ;;  %v252_v48 = vmul.f32 %v2126_v44, %v69_v2  ;;  %v376_v0 = vsel %vm321_vm0, %v255_v57, 0.0  ;;  %v268_v55 = vmul.f32 %v2126_v44, %v2149_v3 }
  0xc1   :  { %v367_v54 = vsel %vm321_vm0, %v252_v48, 0.0 }
  0xc2   :  { %v2153_v6 = vpop.trf.xlu0  ;;  %v2157_v9 = vpop.trf.xlu1 }
  0xc3   :  { %341 = vadd.xlane.f32.xlu1 %v340_v4  ;;  %v269_v48 = vmul.f32 %v2126_v44, %v2153_v6 }
  0xc5   :  { %v418_v22 = vsel %vm321_vm0, %v269_v48, 0.0 }
  0xc6   :  { %v2159_v10 = vpop.trf.xlu0  ;;  %v2165_v14 = vpop.trf.xlu1 }
  0xc7   :  { %344 = vadd.xlane.f32.xlu1 %v343_v7  ;;  %v385_v7 = vsel %vm321_vm0, %v258_v29, 0.0  ;;  %v270_v63 = vmul.f32 %v2126_v44, %v2159_v10 }
  0xca   :  { %v2163_v13 = vpop.trf.xlu0  ;;  %v2173_v20 = vpop.trf.xlu1 }
  0xcb   :  { %347 = vadd.xlane.f32.xlu1 %v346_v11  ;;  %v388_v11 = vsel %vm321_vm0, %v259_v31, 0.0  ;;  %v271_v3 = vmul.f32 %v2126_v44, %v2163_v13 }
  0xcd   :  { %v424_v23 = vsel %vm321_vm0, %v271_v3, 0.0 }
  0xce   :  { %v2169_v17 = vpop.trf.xlu0  ;;  %v2179_v26 = vpop.trf.xlu1 }
  0xcf   :  { %350 = vadd.xlane.f32.xlu1 %v349_v15  ;;  %v391_v15 = vsel %vm321_vm0, %v260_v33, 0.0  ;;  %v272_v6 = vmul.f32 %v2126_v44, %v2169_v17 }
  0xd1   :  { %v427_v27 = vsel %vm321_vm0, %v272_v6, 0.0 }
  0xd2   :  { %v2175_v21 = vpop.trf.xlu0  ;;  %v2189_v40 = vpop.trf.xlu1 }
  0xd3   :  { %353 = vadd.xlane.f32.xlu1 %v352_v18  ;;  %v394_v18 = vsel %vm321_vm0, %v261_v35, 0.0  ;;  %v273_v10 = vmul.f32 %v2126_v44, %v2175_v21 }
  0xd5   :  { %v430_v29 = vsel %vm321_vm0, %v273_v10, 0.0 }
  0xd6   :  { %v2181_v28 = vpop.trf.xlu0  ;;  %v2197_v49 = vpop.trf.xlu1 }
  0xd7   :  { %356 = vadd.xlane.f32.xlu1 %v355_v24  ;;  %v274_v13 = vmul.f32 %v2126_v44, %v2181_v28 }
  0xda   :  { %v2185_v34 = vpop.trf.xlu0  ;;  %v2212_v60 = vpop.trf.xlu1 }
  0xdb   :  { %359 = vadd.xlane.f32.xlu1 %v358_v30  ;;  %v400_v30 = vsel %vm321_vm0, %v263_v39, 0.0  ;;  %v275_v17 = vmul.f32 %v2126_v44, %v2185_v34 }
  0xde   :  { %v2191_v42 = vpop.trf.xlu0  ;;  %v2225_v2 = vpop.trf.xlu1 }
  0xdf   :  { %362 = vadd.xlane.f32.xlu1 %v361_v36  ;;  %v276_v21 = vmul.f32 %v2126_v44, %v2191_v42 }
  0xe2   :  { %v2199_v50 = vpop.trf.xlu0  ;;  %v2240_v12 = vpop.trf.xlu1 }
  0xe3   :  { %365 = vadd.xlane.f32.xlu1 %v364_v46  ;;  %v409_v46 = vsel %vm321_vm0, %v266_v47, 0.0  ;;  %v277_v28 = vmul.f32 %v2126_v44, %v2199_v50 }
  0xe5   :  { %323 = vadd.xlane.f32.xlu0 %v322_v53  ;;  %v415_v53 = vsel %vm321_vm0, %v268_v55, 0.0  ;;  %v442_v35 = vsel %vm321_vm0, %v277_v28, 0.0 }
  0xe6   :  { %v2207_v56 = vpop.trf.xlu0  ;;  %v2253_v24 = vpop.trf.xlu1 }
  0xe7   :  { %368 = vadd.xlane.f32.xlu1 %v367_v54  ;;  %v278_v34 = vmul.f32 %v2126_v44, %v2207_v56 }
  0xe9   :  { %371 = vadd.xlane.f32.xlu0 %v370_v58  ;;  %v421_v58 = vsel %vm321_vm0, %v270_v63, 0.0  ;;  %v445_v37 = vsel %vm321_vm0, %v278_v34, 0.0 }
  0xea   :  { %v2217_v62 = vpop.trf.xlu0  ;;  %v2268_v45 = vpop.trf.xlu1 }
  0xeb   :  { %374 = vadd.xlane.f32.xlu1 %v373_v61  ;;  %v279_v42 = vmul.f32 %v2126_v44, %v2217_v62 }
  0xed   :  { %377 = vadd.xlane.f32.xlu0 %v376_v0  ;;  %v448_v39 = vsel %vm321_vm0, %v279_v42, 0.0 }
  0xee   :  { %v2227_v4 = vpop.trf.xlu0  ;;  %v2281_v54 = vpop.trf.xlu1 }
  0xef   :  { %380 = vadd.xlane.f32.xlu1 %v379_v1  ;;  %v433_v1 = vsel %vm321_vm0, %v274_v13, 0.0  ;;  %v280_v50 = vmul.f32 %v2126_v44, %v2227_v4 }
  0xf1   :  { %383 = vadd.xlane.f32.xlu0 %v382_v5  ;;  %v436_v5 = vsel %vm321_vm0, %v275_v17, 0.0 }
  0xf2   :  { %v2235_v8 = vpop.trf.xlu0  ;;  %v2294_v61 = vpop.trf.xlu1 }
  0xf3   :  { %386 = vadd.xlane.f32.xlu1 %v385_v7  ;;  %v439_v7 = vsel %vm321_vm0, %v276_v21, 0.0  ;;  %v281_v56 = vmul.f32 %v2126_v44, %v2235_v8 }
  0xf5   :  { %389 = vadd.xlane.f32.xlu0 %v388_v11 }
  0xf6   :  { %v2245_v16 = vpop.trf.xlu0  ;;  %v2307_v31 = vpop.trf.xlu1 }
  0xf7   :  { %392 = vadd.xlane.f32.xlu1 %v391_v15  ;;  %v282_v62 = vmul.f32 %v2126_v44, %v2245_v16  ;;  %v285_v16 = vmul.f32 %v2126_v44, %v2157_v9  ;;  %v288_v9 = vmul.f32 %v2126_v44, %v2179_v26  ;;  %v291_v26 = vmul.f32 %v2126_v44, %v2212_v60 }
  0xf8   :  { %v294_v60 = vmul.f32 %v2126_v44, %v2253_v24  ;;  %v297_v24 = vmul.f32 %v2126_v44, %v2294_v61 }
  0xf9   :  { %395 = vadd.xlane.f32.xlu0 %v394_v18  ;;  %v451_v18 = vsel %vm321_vm0, %v280_v50, 0.0  ;;  %v466_v55 = vsel %vm321_vm0, %v285_v16, 0.0  ;;  %v484_v10 = vsel %vm321_vm0, %v291_v26, 0.0 }
  0xfa   :  { %v2255_v25 = vpop.trf.xlu0  ;;  %v2320_v11 = vpop.trf.xlu1  ;;  %v502_v61 = vsel %vm321_vm0, %v297_v24, 0.0 }
  0xfb   :  { %398 = vadd.xlane.f32.xlu1 %v397_v19  ;;  %v283_v4 = vmul.f32 %v2126_v44, %v2255_v25  ;;  %v454_v19 = vsel %vm321_vm0, %v281_v56, 0.0  ;;  %v286_v25 = vmul.f32 %v2126_v44, %v2165_v14  ;;  %v289_v14 = vmul.f32 %v2126_v44, %v2189_v40 }
  0xfc   :  { %v292_v40 = vmul.f32 %v2126_v44, %v2225_v2  ;;  %v295_v2 = vmul.f32 %v2126_v44, %v2268_v45  ;;  %v298_v45 = vmul.f32 %v2126_v44, %v2307_v31 }
  0xfd   :  { %401 = vadd.xlane.f32.xlu0 %v400_v30  ;;  %v457_v30 = vsel %vm321_vm0, %v282_v62, 0.0  ;;  %v460_v47 = vsel %vm321_vm0, %v283_v4, 0.0  ;;  %v478_v3 = vsel %vm321_vm0, %v289_v14, 0.0 }
  0xfe   :  { %v2263_v36 = vpop.trf.xlu0  ;;  %v2333_v41 = vpop.trf.xlu1  ;;  %v505_v50 = vsel %vm321_vm0, %v298_v45, 0.0 }
  0xff   :  { %404 = vadd.xlane.f32.xlu1 %v403_v32  ;;  %v284_v43 = vmul.f32 %v2126_v44, %v2263_v36 }
 0x101   :  { %407 = vadd.xlane.f32.xlu0 %v406_v38  ;;  %v463_v32 = vsel %vm321_vm0, %v284_v43, 0.0  ;;  %v287_v38 = vmul.f32 %v2126_v44, %v2173_v20  ;;  %v290_v20 = vmul.f32 %v2126_v44, %v2197_v49  ;;  %v293_v49 = vmul.f32 %v2126_v44, %v2240_v12 }
 0x102   :  { %v2273_v59 = vpop.trf.xlu0  ;;  %v2347_v51 = vpop.trf.xlu1  ;;  %v296_v12 = vmul.f32 %v2126_v44, %v2281_v54  ;;  %v299_v54 = vmul.f32 %v2126_v44, %v2320_v11 }
 0x103   :  { %410 = vadd.xlane.f32.xlu1 %v409_v46  ;;  %v469_v46 = vsel %vm321_vm0, %v286_v25, 0.0  ;;  %v481_v6 = vsel %vm321_vm0, %v290_v20, 0.0  ;;  %v301_v31 = vmul.f32 %v2126_v44, %v2273_v59 }
 0x104   :  { %v508_v56 = vsel %vm321_vm0, %v299_v54, 0.0 }
 0x105   :  { %413 = vadd.xlane.f32.xlu0 %v412_v52  ;;  %v472_v52 = vsel %vm321_vm0, %v287_v38, 0.0  ;;  %v514_v59 = vsel %vm321_vm0, %v301_v31, 0.0 }
 0x106   :  { %v2286_v57 = vpop.trf.xlu0  ;;  %v2359_v48 = vpop.trf.xlu1 }
 0x107   :  { %416 = vadd.xlane.f32.xlu1 %v415_v53  ;;  %v475_v53 = vsel %vm321_vm0, %v288_v9, 0.0  ;;  %v302_v62 = vmul.f32 %v2126_v44, %v2286_v57 }
 0x109   :  { %419 = vadd.xlane.f32.xlu0 %v418_v22 }
 0x10a   :  { %v2299_v0 = vpop.trf.xlu0  ;;  %v2372_v22 = vpop.trf.xlu1 }
 0x10b   :  { %422 = vadd.xlane.f32.xlu1 %v421_v58 }
 0x10d   :  { %425 = vadd.xlane.f32.xlu0 %v424_v23  ;;  %v487_v23 = vsel %vm321_vm0, %v292_v40, 0.0 }
 0x10e   :  { %v2312_v33 = vpop.trf.xlu0  ;;  %v2385_v13 = vpop.trf.xlu1 }
 0x10f   :  { %428 = vadd.xlane.f32.xlu1 %v427_v27  ;;  %v490_v27 = vsel %vm321_vm0, %v293_v49, 0.0 }
 0x111   :  { %431 = vadd.xlane.f32.xlu0 %v430_v29  ;;  %v493_v29 = vsel %vm321_vm0, %v294_v60, 0.0 }
 0x112   :  { %v2325_v15 = vpop.trf.xlu0 }
 0x113   :  { %434 = vadd.xlane.f32.xlu1 %v433_v1  ;;  %v496_v1 = vsel %vm321_vm0, %v295_v2, 0.0 }
 0x115   :  { %437 = vadd.xlane.f32.xlu0 %v436_v5  ;;  %v499_v5 = vsel %vm321_vm0, %v296_v12, 0.0 }
 0x116   :  { %v2340_v8 = vpop.trf.xlu0 }
 0x117   :  { %440 = vadd.xlane.f32.xlu1 %v439_v7 }
 0x119   :  { %443 = vadd.xlane.f32.xlu0 %v442_v35  ;;  %v300_v35 = vmul.f32 %v2126_v44, %v2333_v41  ;;  %v303_v41 = vmul.f32 %v2126_v44, %v2299_v0 }
 0x11a   :  { %v2351_v36 = vpop.trf.xlu0 }
 0x11b   :  { %446 = vadd.xlane.f32.xlu1 %v445_v37  ;;  %v520_v25 = vsel %vm321_vm0, %v303_v41, 0.0  ;;  %v307_v14 = vmul.f32 %v2126_v44, %v2351_v36  ;;  %v1080_v36 = vld [vmem:[%s3566_s2 + $0x10] sm:$0xff] }
 0x11d   :  { %449 = vadd.xlane.f32.xlu0 %v448_v39 }
 0x11e   :  { %v2364_v63 = vpop.trf.xlu0 }
 0x11f   :  { %452 = vadd.xlane.f32.xlu1 %v451_v18  ;;  %v511_v18 = vsel %vm321_vm0, %v300_v35, 0.0 }
 0x121   :  { %455 = vadd.xlane.f32.xlu0 %v454_v19 }
 0x122   :  { %v2377_v58 = vpop.trf.xlu0 }
 0x123   :  { %458 = vadd.xlane.f32.xlu1 %v457_v30  ;;  %v304_v30 = vmul.f32 %v2126_v44, %v2312_v33  ;;  %v306_v33 = vmul.f32 %v2126_v44, %v2340_v8  ;;  %v309_v49 = vmul.f32 %v2126_v44, %v2377_v58  ;;  %v1082_v58 = vld [vmem:[%s3566_s2 + $0x20] sm:$0xff] }
 0x125   :  { %461 = vadd.xlane.f32.xlu0 %v460_v47  ;;  %v517_v47 = vsel %vm321_vm0, %v302_v62, 0.0  ;;  %v529_v40 = vsel %vm321_vm0, %v306_v33, 0.0 }
 0x126   :  { %v2390_v17 = vpop.trf.xlu0 }
 0x127   :  { %464 = vadd.xlane.f32.xlu1 %v463_v32  ;;  %v305_v32 = vmul.f32 %v2126_v44, %v2325_v15  ;;  %v310_v12 = vmul.f32 %v2126_v44, %v2390_v17 }
 0x129   :  { %467 = vadd.xlane.f32.xlu0 %v466_v55  ;;  %v541_v35 = vsel %vm321_vm0, %v310_v12, 0.0  ;;  %v1091_v12 = vld [vmem:[%s3566_s2 + $0x68] sm:$0xff] }
 0x12a   :  { %v2401_v34 = vpop.trf.xlu0 }
 0x12b   :  { %470 = vadd.xlane.f32.xlu1 %v469_v46  ;;  %v523_v46 = vsel %vm321_vm0, %v304_v30, 0.0  ;;  %v311_v45 = vmul.f32 %v2126_v44, %v2401_v34 }
 0x12d   :  { %473 = vadd.xlane.f32.xlu0 %v472_v52  ;;  %v526_v52 = vsel %vm321_vm0, %v305_v32, 0.0  ;;  %v1087_v32 = vld [vmem:[%s3566_s2 + $0x48] sm:$0xff] }
 0x12e   :  { %v2412_v11 = vpop.trf.xlu0 }
 0x12f   :  { %476 = vadd.xlane.f32.xlu1 %v475_v53  ;;  %v312_v34 = vmul.f32 %v2126_v44, %v2412_v11  ;;  %v544_v11 = vsel %vm321_vm0, %v311_v45, 0.0 }
 0x131   :  { %479 = vadd.xlane.f32.xlu0 %v478_v3  ;;  %v308_v3 = vmul.f32 %v2126_v44, %v2364_v63  ;;  %v532_v63 = vsel %vm321_vm0, %v307_v14, 0.0  ;;  %v547_v30 = vsel %vm321_vm0, %v312_v34, 0.0 }
 0x132   :  { %v2423_v57 = vpop.trf.xlu0 }
 0x133   :  { %482 = vadd.xlane.f32.xlu1 %v481_v6  ;;  %v1081_v6 = vld [vmem:[%s3566_s2 + $0x18] sm:$0xff] }
 0x135   :  { %485 = vadd.xlane.f32.xlu0 %v484_v10 }
 0x136   :  { %v195_v26 = vpop.trf.xlu0 }
 0x137   :  { %488 = vadd.xlane.f32.xlu1 %v487_v23 }
 0x139   :  { %491 = vadd.xlane.f32.xlu0 %v490_v27 }
 0x13b   :  { %494 = vadd.xlane.f32.xlu1 %v493_v29  ;;  %v535_v29 = vsel %vm321_vm0, %v308_v3, 0.0  ;;  %v1089_v3 = vld [vmem:[%s3566_s2 + $0x58] sm:$0xff] }
 0x13c   :  { %v327_v21 = vpop.xlane.xlu1 %326 }
 0x13d   :  { %v1589_v28 = vmul.f32 -1.442695, %v327_v21  ;;  %497 = vadd.xlane.f32.xlu0 %v496_v1  ;;  %v196_v1 = vpop.trf.xlu0 }
 0x13f   :  { %1673 = vpow2.f32 %v1589_v28  ;;  %500 = vadd.xlane.f32.xlu1 %v499_v5  ;;  %v1083_v28 = vld [vmem:[%s3566_s2 + $0x28] sm:$0xff]  ;;  %v538_v5 = vsel %vm321_vm0, %v309_v49, 0.0 }
 0x140   :  { %v330_v7 = vpop.xlane.xlu1 %329 }
 0x141   :  { %v1590_v42 = vmul.f32 -1.442695, %v330_v7  ;;  %503 = vadd.xlane.f32.xlu0 %v502_v61 }
 0x143   :  { %1675 = vpow2.f32 %v1590_v42  ;;  %506 = vadd.xlane.f32.xlu1 %v505_v50 }
 0x144   :  { %v333_v37 = vpop.xlane.xlu1 %332 }
 0x145   :  { %v1591_v39 = vmul.f32 -1.442695, %v333_v37  ;;  %509 = vadd.xlane.f32.xlu0 %v508_v56  ;;  %v1084_v37 = vld [vmem:[%s3566_s2 + $0x30] sm:$0xff]  ;;  %v1085_v56 = vld [vmem:[%s3566_s2 + $0x38] sm:$0xff] }
 0x147   :  { %1677 = vpow2.f32 %v1591_v39  ;;  %512 = vadd.xlane.f32.xlu1 %v511_v18  ;;  %v313_v39 = vmul.f32 %v2126_v44, %v2423_v57  ;;  %v1086_v57 = vld [vmem:[%s3566_s2 + $0x40] sm:$0xff] }
 0x148   :  { %v336_v4 = vpop.xlane.xlu1 %335 }
 0x149   :  { %v1674_v19 = vpop.eup %1673  ;;  %v1592_v43 = vmul.f32 -1.442695, %v336_v4  ;;  %515 = vadd.xlane.f32.xlu0 %v514_v59  ;;  %v197_v4 = vpop.trf.xlu0 }
 0x14a   :  { %v827_v16 = vadd.f32 1.0, %v1674_v19 }
 0x14b   :  { %1679 = vpow2.f32 %v1592_v43  ;;  %518 = vadd.xlane.f32.xlu1 %v517_v47  ;;  %v314_v43 = vmul.f32 %v2126_v44, %v195_v26  ;;  %v1088_v26 = vld [vmem:[%s3566_s2 + $0x50] sm:$0xff] }
 0x14c   :  { %1681 = vrcp.f32 %v827_v16  ;;  %v339_v0 = vpop.xlane.xlu1 %338 }
 0x14d   :  { %v1676_v38 = vpop.eup %1675  ;;  %v1593_v55 = vmul.f32 -1.442695, %v339_v0  ;;  %521 = vadd.xlane.f32.xlu0 %v520_v25  ;;  %v315_v0 = vmul.f32 %v2126_v44, %v196_v1  ;;  %v320_v1 = vmul.f32 %v2126_v44, %v2385_v13 }
 0x14e   :  { %v828_v9 = vadd.f32 1.0, %v1676_v38  ;;  %v550_v38 = vsel %vm321_vm0, %v313_v39, 0.0 }
 0x14f   :  { %1683 = vpow2.f32 %v1593_v55  ;;  %524 = vadd.xlane.f32.xlu1 %v523_v46  ;;  %v316_v55 = vmul.f32 %v2126_v44, %v197_v4 }
 0x150   :  { %1685 = vrcp.f32 %v828_v9  ;;  %v342_v15 = vpop.xlane.xlu1 %341 }
 0x151   :  { %v1678_v20 = vpop.eup %1677  ;;  %v1594_v53 = vmul.f32 -1.442695, %v342_v15  ;;  %527 = vadd.xlane.f32.xlu0 %v526_v52  ;;  %v553_v15 = vsel %vm321_vm0, %v314_v43, 0.0 }
 0x152   :  { %v829_v8 = vadd.f32 1.0, %v1678_v20 }
 0x153   :  { %1687 = vpow2.f32 %v1594_v53  ;;  %530 = vadd.xlane.f32.xlu1 %v529_v40  ;;  %v317_v53 = vmul.f32 %v2126_v44, %v2347_v51  ;;  %v556_v40 = vsel %vm321_vm0, %v315_v0, 0.0 }
 0x154   :  { %1689 = vrcp.f32 %v829_v8  ;;  %v345_v10 = vpop.xlane.xlu1 %344 }
 0x155   :  { %v1680_v60 = vpop.eup %1679  ;;  %v1595_v23 = vmul.f32 -1.442695, %v345_v10  ;;  %533 = vadd.xlane.f32.xlu0 %v532_v63  ;;  %v318_v10 = vmul.f32 %v2126_v44, %v2359_v48  ;;  %v562_v48 = vsel %vm321_vm0, %v317_v53, 0.0 }
 0x156   :  { %v1682_v2 = vpop.eup %1681  ;;  %v830_v27 = vadd.f32 1.0, %v1680_v60 }
 0x157   :  { %v1248_v24 = vmul.f32 %v1682_v2, %v1080_v36  ;;  %v1249_v21 = vmul.f32 %v1682_v2, %v1081_v6  ;;  %1691 = vpow2.f32 %v1595_v23  ;;  %536 = vadd.xlane.f32.xlu1 %v535_v29  ;;  %v559_v36 = vsel %vm321_vm0, %v316_v55, 0.0 }
 0x158   :  { %1693 = vrcp.f32 %v830_v27  ;;  %v348_v17 = vpop.xlane.xlu1 %347  ;;  %v319_v2 = vmul.f32 %v2126_v44, %v2372_v22  ;;  %v1090_v27 = vld [vmem:[%s3566_s2 + $0x60] sm:$0xff] }
 0x159   :  { %v1684_v54 = vpop.eup %1683  ;;  %1417 = vst [vmem:[%s3567_s3 + $0x10] sm:$0xff] %v1248_v24  ;;  %1418 = vst.msk [vmem:[%s3567_s3 + $0x18] sm:$0xff] %vm1415_vm1, %v1249_v21  ;;  %v1596_v7 = vmul.f32 -1.442695, %v348_v17  ;;  %539 = vadd.xlane.f32.xlu0 %v538_v5  ;;  %v1092_v5 = vld [vmem:[%s3566_s2 + $0x70] sm:$0xff] }
 0x15a   :  { %v1686_v61 = vpop.eup %1685  ;;  %v831_v42 = vadd.f32 1.0, %v1684_v54  ;;  %v1093_v54 = vld [vmem:[%s3566_s2 + $0x78] sm:$0xff] }
 0x15b   :  { %v1250_v50 = vmul.f32 %v1686_v61, %v1082_v58  ;;  %v1251_v31 = vmul.f32 %v1686_v61, %v1083_v28  ;;  %1695 = vpow2.f32 %v1596_v7  ;;  %542 = vadd.xlane.f32.xlu1 %v541_v35  ;;  %v565_v28 = vsel %vm321_vm0, %v318_v10, 0.0 }
 0x15c   :  { %1697 = vrcp.f32 %v831_v42  ;;  %v351_v62 = vpop.xlane.xlu1 %350  ;;  %v568_v61 = vsel %vm321_vm0, %v319_v2, 0.0  ;;  %v571_v35 = vsel %vm321_vm0, %v320_v1, 0.0 }
 0x15d   :  { %v1688_v18 = vpop.eup %1687  ;;  %1419 = vst [vmem:[%s3567_s3 + $0x20] sm:$0xff] %v1250_v50  ;;  %1420 = vst.msk [vmem:[%s3567_s3 + $0x28] sm:$0xff] %vm1415_vm1, %v1251_v31  ;;  %v1597_v41 = vmul.f32 -1.442695, %v351_v62  ;;  %545 = vadd.xlane.f32.xlu0 %v544_v11 }
 0x15e   :  { %v1690_v59 = vpop.eup %1689  ;;  %v832_v19 = vadd.f32 1.0, %v1688_v18 }
 0x15f   :  { %v1252_v16 = vmul.f32 %v1690_v59, %v1084_v37  ;;  %v1253_v47 = vmul.f32 %v1690_v59, %v1085_v56  ;;  %1699 = vpow2.f32 %v1597_v41  ;;  %548 = vadd.xlane.f32.xlu1 %v547_v30  ;;  %v1094_v37 = vld [vmem:[%s3566_s2 + $0x80] sm:$0xff]  ;;  %v1095_v56 = vld [vmem:[%s3566_s2 + $0x88] sm:$0xff]  ;;  %v1096_v30 = vld [vmem:[%s3566_s2 + $0x90] sm:$0xff] }
 0x160   :  { %1701 = vrcp.f32 %v832_v19  ;;  %v354_v25 = vpop.xlane.xlu1 %353 }
 0x161   :  { %v1692_v33 = vpop.eup %1691  ;;  %1421 = vst [vmem:[%s3567_s3 + $0x30] sm:$0xff] %v1252_v16  ;;  %1422 = vst.msk [vmem:[%s3567_s3 + $0x38] sm:$0xff] %vm1415_vm1, %v1253_v47  ;;  %v1598_v9 = vmul.f32 -1.442695, %v354_v25  ;;  %551 = vadd.xlane.f32.xlu0 %v550_v38  ;;  %v1097_v16 = vld [vmem:[%s3566_s2 + $0x98] sm:$0xff] }
 0x162   :  { %v1694_v46 = vpop.eup %1693  ;;  %v833_v14 = vadd.f32 1.0, %v1692_v33 }
 0x163   :  { %v1254_v52 = vmul.f32 %v1694_v46, %v1086_v57  ;;  %v1255_v20 = vmul.f32 %v1694_v46, %v1087_v32  ;;  %1703 = vpow2.f32 %v1598_v9  ;;  %554 = vadd.xlane.f32.xlu1 %v553_v15  ;;  %v1098_v46 = vld [vmem:[%s3566_s2 + $0xa0] sm:$0xff] }
 0x164   :  { %1705 = vrcp.f32 %v833_v14  ;;  %v357_v8 = vpop.xlane.xlu1 %356  ;;  %v1099_v14 = vld [vmem:[%s3566_s2 + $0xa8] sm:$0xff] }
 0x165   :  { %v1696_v6 = vpop.eup %1695  ;;  %1423 = vst [vmem:[%s3567_s3 + $0x40] sm:$0xff] %v1254_v52  ;;  %1424 = vst.msk [vmem:[%s3567_s3 + $0x48] sm:$0xff] %vm1415_vm1, %v1255_v20  ;;  %v1599_v51 = vmul.f32 -1.442695, %v357_v8  ;;  %557 = vadd.xlane.f32.xlu0 %v556_v40 }
 0x166   :  { %v1698_v49 = vpop.eup %1697  ;;  %v834_v63 = vadd.f32 1.0, %v1696_v6  ;;  %v1100_v6 = vld [vmem:[%s3566_s2 + $0xb0] sm:$0xff] }
 0x167   :  { %v1256_v60 = vmul.f32 %v1698_v49, %v1088_v26  ;;  %v1257_v23 = vmul.f32 %v1698_v49, %v1089_v3  ;;  %1707 = vpow2.f32 %v1599_v51  ;;  %560 = vadd.xlane.f32.xlu1 %v559_v36  ;;  %v1101_v51 = vld [vmem:[%s3566_s2 + $0xb8] sm:$0xff] }
 0x168   :  { %1709 = vrcp.f32 %v834_v63  ;;  %v360_v29 = vpop.xlane.xlu1 %359 }
 0x169   :  { %v1700_v24 = vpop.eup %1699  ;;  %1425 = vst [vmem:[%s3567_s3 + $0x50] sm:$0xff] %v1256_v60  ;;  %1426 = vst.msk [vmem:[%s3567_s3 + $0x58] sm:$0xff] %vm1415_vm1, %v1257_v23  ;;  %v1600_v22 = vmul.f32 -1.442695, %v360_v29  ;;  %563 = vadd.xlane.f32.xlu0 %v562_v48 }
 0x16a   :  { %v1702_v21 = vpop.eup %1701  ;;  %v835_v58 = vadd.f32 1.0, %v1700_v24  ;;  %v1102_v24 = vld [vmem:[%s3566_s2 + $0xc0] sm:$0xff] }
 0x16b   :  { %v1258_v45 = vmul.f32 %v1702_v21, %v1090_v27  ;;  %v1259_v17 = vmul.f32 %v1702_v21, %v1091_v12  ;;  %1711 = vpow2.f32 %v1600_v22  ;;  %566 = vadd.xlane.f32.xlu1 %v565_v28  ;;  %v1103_v22 = vld [vmem:[%s3566_s2 + $0xc8] sm:$0xff] }
 0x16c   :  { %1713 = vrcp.f32 %v835_v58  ;;  %v363_v7 = vpop.xlane.xlu1 %362 }
 0x16d   :  { %v1704_v44 = vpop.eup %1703  ;;  %1427 = vst [vmem:[%s3567_s3 + $0x60] sm:$0xff] %v1258_v45  ;;  %1428 = vst.msk [vmem:[%s3567_s3 + $0x68] sm:$0xff] %vm1415_vm1, %v1259_v17  ;;  %v1601_v13 = vmul.f32 -1.442695, %v363_v7  ;;  %569 = vadd.xlane.f32.xlu0 %v568_v61 }
 0x16e   :  { %v1706_v42 = vpop.eup %1705  ;;  %v836_v34 = vadd.f32 1.0, %v1704_v44 }
 0x16f   :  { %v1260_v50 = vmul.f32 %v1706_v42, %v1092_v5  ;;  %v1261_v31 = vmul.f32 %v1706_v42, %v1093_v54  ;;  %1715 = vpow2.f32 %v1601_v13  ;;  %572 = vadd.xlane.f32.xlu1 %v571_v35  ;;  %v1104_v13 = vld [vmem:[%s3566_s2 + $0xd0] sm:$0xff]  ;;  %v1105_v42 = vld [vmem:[%s3566_s2 + $0xd8] sm:$0xff] }
 0x170   :  { %1717 = vrcp.f32 %v836_v34  ;;  %v366_v39 = vpop.xlane.xlu1 %365 }
 0x171   :  { %v1708_v62 = vpop.eup %1707  ;;  %1429 = vst [vmem:[%s3567_s3 + $0x70] sm:$0xff] %v1260_v50  ;;  %1430 = vst.msk [vmem:[%s3567_s3 + $0x78] sm:$0xff] %vm1415_vm1, %v1261_v31  ;;  %v1602_v11 = vmul.f32 -1.442695, %v366_v39 }
 0x172   :  { %v1710_v18 = vpop.eup %1709  ;;  %v837_v41 = vadd.f32 1.0, %v1708_v62  ;;  %v324_v4 = vpop.xlane.xlu0 %323 }
 0x173   :  { %v1262_v59 = vmul.f32 %v1710_v18, %v1094_v37  ;;  %v1263_v19 = vmul.f32 %v1710_v18, %v1095_v56  ;;  %1719 = vpow2.f32 %v1602_v11  ;;  %v1588_v43 = vmul.f32 -1.442695, %v324_v4  ;;  %v1106_v4 = vld [vmem:[%s3566_s2 + $0xe0] sm:$0xff] }
 0x174   :  { %1721 = vrcp.f32 %v837_v41  ;;  %v369_v47 = vpop.xlane.xlu1 %368 }
 0x175   :  { %v1712_v57 = vpop.eup %1711  ;;  %1431 = vst [vmem:[%s3567_s3 + $0x80] sm:$0xff] %v1262_v59  ;;  %1432 = vst.msk [vmem:[%s3567_s3 + $0x88] sm:$0xff] %vm1415_vm1, %v1263_v19  ;;  %1723 = vpow2.f32 %v1588_v43  ;;  %v1603_v32 = vmul.f32 -1.442695, %v369_v47  ;;  %v1107_v59 = vld [vmem:[%s3566_s2 + $0xe8] sm:$0xff] }
 0x176   :  { %v1714_v0 = vpop.eup %1713  ;;  %v838_v25 = vadd.f32 1.0, %v1712_v57  ;;  %v372_v38 = vpop.xlane.xlu0 %371  ;;  %v1078_v57 = vld [vmem:[%s3566_s2] sm:$0xff] }
 0x177   :  { %v1264_v55 = vmul.f32 %v1714_v0, %v1096_v30  ;;  %v1265_v33 = vmul.f32 %v1714_v0, %v1097_v16  ;;  %1725 = vpow2.f32 %v1603_v32  ;;  %v1604_v9 = vmul.f32 -1.442695, %v372_v38  ;;  %v1079_v32 = vld [vmem:[%s3566_s2 + $0x8] sm:$0xff] }
 0x178   :  { %1727 = vrcp.f32 %v838_v25  ;;  %v375_v15 = vpop.xlane.xlu1 %374 }
 0x179   :  { %v1716_v52 = vpop.eup %1715  ;;  %1433 = vst [vmem:[%s3567_s3 + $0x90] sm:$0xff] %v1264_v55  ;;  %1434 = vst.msk [vmem:[%s3567_s3 + $0x98] sm:$0xff] %vm1415_vm1, %v1265_v33  ;;  %1729 = vpow2.f32 %v1604_v9  ;;  %v1605_v20 = vmul.f32 -1.442695, %v375_v15  ;;  %v1109_v15 = vld [vmem:[%s3566_s2 + $0xf8] sm:$0xff] }
 0x17a   :  { %v1718_v53 = vpop.eup %1717  ;;  %v839_v26 = vadd.f32 1.0, %v1716_v52  ;;  %v378_v3 = vpop.xlane.xlu0 %377 }
 0x17b   :  { %v1266_v8 = vmul.f32 %v1718_v53, %v1098_v46  ;;  %v1267_v40 = vmul.f32 %v1718_v53, %v1099_v14  ;;  %1731 = vpow2.f32 %v1605_v20  ;;  %v1606_v36 = vmul.f32 -1.442695, %v378_v3  ;;  %v1108_v14 = vld [vmem:[%s3566_s2 + $0xf0] sm:$0xff] }
 0x17c   :  { %1733 = vrcp.f32 %v839_v26  ;;  %v381_v49 = vpop.xlane.xlu1 %380 }
 0x17d   :  { %v1720_v10 = vpop.eup %1719  ;;  %1435 = vst [vmem:[%s3567_s3 + $0xa0] sm:$0xff] %v1266_v8  ;;  %1436 = vst.msk [vmem:[%s3567_s3 + $0xa8] sm:$0xff] %vm1415_vm1, %v1267_v40  ;;  %1735 = vpow2.f32 %v1606_v36  ;;  %v1607_v63 = vmul.f32 -1.442695, %v381_v49  ;;  %v1110_v36 = vld [vmem:[%s3566_s2 + $0x100] sm:$0xff] }
 0x17e   :  { %v1722_v60 = vpop.eup %1721  ;;  %v840_v23 = vadd.f32 1.0, %v1720_v10  ;;  %v384_v2 = vpop.xlane.xlu0 %383 }
 0x17f   :  { %v1724_v27 = vpop.eup %1723  ;;  %v1268_v12 = vmul.f32 %v1722_v60, %v1100_v6  ;;  %v1269_v29 = vmul.f32 %v1722_v60, %v1101_v51  ;;  %1737 = vpow2.f32 %v1607_v63  ;;  %v1608_v48 = vmul.f32 -1.442695, %v384_v2  ;;  %v1111_v6 = vld [vmem:[%s3566_s2 + $0x108] sm:$0xff] }
 0x180   :  { %1739 = vrcp.f32 %v840_v23  ;;  %v826_v21 = vadd.f32 1.0, %v1724_v27  ;;  %v387_v1 = vpop.xlane.xlu1 %386  ;;  %v1112_v27 = vld [vmem:[%s3566_s2 + $0x110] sm:$0xff] }
 0x181   :  { %v1726_v58 = vpop.eup %1725  ;;  %1437 = vst [vmem:[%s3567_s3 + $0xb0] sm:$0xff] %v1268_v12  ;;  %1438 = vst.msk [vmem:[%s3567_s3 + $0xb8] sm:$0xff] %vm1415_vm1, %v1269_v29  ;;  %1741 = vpow2.f32 %v1608_v48  ;;  %v1609_v28 = vmul.f32 -1.442695, %v387_v1  ;;  %v1113_v12 = vld [vmem:[%s3566_s2 + $0x118] sm:$0xff] }
 0x182   :  { %v1728_v45 = vpop.eup %1727  ;;  %1743 = vrcp.f32 %v826_v21  ;;  %v841_v17 = vadd.f32 1.0, %v1726_v58  ;;  %v390_v5 = vpop.xlane.xlu0 %389 }
 0x183   :  { %v1730_v54 = vpop.eup %1729  ;;  %v1270_v7 = vmul.f32 %v1728_v45, %v1102_v24  ;;  %v1271_v61 = vmul.f32 %v1728_v45, %v1103_v22  ;;  %1745 = vpow2.f32 %v1609_v28  ;;  %v1610_v44 = vmul.f32 -1.442695, %v390_v5  ;;  %v1114_v28 = vld [vmem:[%s3566_s2 + $0x120] sm:$0xff]  ;;  %v1115_v45 = vld [vmem:[%s3566_s2 + $0x128] sm:$0xff] }
 0x184   :  { %1747 = vrcp.f32 %v841_v17  ;;  %v842_v34 = vadd.f32 1.0, %v1730_v54  ;;  %v393_v35 = vpop.xlane.xlu1 %392 }
 0x185   :  { %v1732_v50 = vpop.eup %1731  ;;  %1439 = vst [vmem:[%s3567_s3 + $0xc0] sm:$0xff] %v1270_v7  ;;  %1440 = vst.msk [vmem:[%s3567_s3 + $0xc8] sm:$0xff] %vm1415_vm1, %v1271_v61  ;;  %1749 = vpow2.f32 %v1610_v44  ;;  %v1611_v31 = vmul.f32 -1.442695, %v393_v35 }
 0x186   :  { %v1734_v37 = vpop.eup %1733  ;;  %1751 = vrcp.f32 %v842_v34  ;;  %v843_v56 = vadd.f32 1.0, %v1732_v50  ;;  %v396_v39 = vpop.xlane.xlu0 %395  ;;  %v1117_v34 = vld [vmem:[%s3566_s2 + $0x138] sm:$0xff] }
 0x187   :  { %v1736_v62 = vpop.eup %1735  ;;  %v1272_v11 = vmul.f32 %v1734_v37, %v1104_v13  ;;  %v1273_v18 = vmul.f32 %v1734_v37, %v1105_v42  ;;  %1753 = vpow2.f32 %v1611_v31  ;;  %v1612_v41 = vmul.f32 -1.442695, %v396_v39  ;;  %v1116_v42 = vld [vmem:[%s3566_s2 + $0x130] sm:$0xff] }
 0x188   :  { %1755 = vrcp.f32 %v843_v56  ;;  %v844_v19 = vadd.f32 1.0, %v1736_v62  ;;  %v399_v43 = vpop.xlane.xlu1 %398 }
 0x189   :  { %v1738_v30 = vpop.eup %1737  ;;  %1441 = vst [vmem:[%s3567_s3 + $0xd0] sm:$0xff] %v1272_v11  ;;  %1442 = vst.msk [vmem:[%s3567_s3 + $0xd8] sm:$0xff] %vm1415_vm1, %v1273_v18  ;;  %1757 = vpow2.f32 %v1612_v41  ;;  %v1613_v16 = vmul.f32 -1.442695, %v399_v43  ;;  %v1118_v11 = vld [vmem:[%s3566_s2 + $0x140] sm:$0xff]  ;;  %v1119_v18 = vld [vmem:[%s3566_s2 + $0x148] sm:$0xff] }
 0x18a   :  { %v1740_v47 = vpop.eup %1739  ;;  %1759 = vrcp.f32 %v844_v19  ;;  %v845_v0 = vadd.f32 1.0, %v1738_v30  ;;  %v402_v25 = vpop.xlane.xlu0 %401 }
 0x18b   :  { %v1742_v38 = vpop.eup %1741  ;;  %v1274_v55 = vmul.f32 %v1740_v47, %v1106_v4  ;;  %v1275_v33 = vmul.f32 %v1740_v47, %v1107_v59  ;;  %1761 = vpow2.f32 %v1613_v16  ;;  %v1614_v9 = vmul.f32 -1.442695, %v402_v25  ;;  %v1120_v47 = vld [vmem:[%s3566_s2 + $0x150] sm:$0xff] }
 0x18c   :  { %v1744_v46 = vpop.eup %1743  ;;  %1763 = vrcp.f32 %v845_v0  ;;  %v846_v52 = vadd.f32 1.0, %v1742_v38  ;;  %v405_v20 = vpop.xlane.xlu1 %404 }
 0x18d   :  { %v1746_v53 = vpop.eup %1745  ;;  %1443 = vst [vmem:[%s3567_s3 + $0xe0] sm:$0xff] %v1274_v55  ;;  %1444 = vst.msk [vmem:[%s3567_s3 + $0xe8] sm:$0xff] %vm1415_vm1, %v1275_v33  ;;  %v1246_v26 = vmul.f32 %v1744_v46, %v1078_v57  ;;  %v1247_v3 = vmul.f32 %v1744_v46, %v1079_v32  ;;  %1765 = vpow2.f32 %v1614_v9  ;;  %v1615_v8 = vmul.f32 -1.442695, %v405_v20  ;;  %v1121_v57 = vld [vmem:[%s3566_s2 + $0x158] sm:$0xff]  ;;  %v1122_v46 = vld [vmem:[%s3566_s2 + $0x160] sm:$0xff] }
 0x18e   :  { %v1748_v40 = vpop.eup %1747  ;;  %1767 = vrcp.f32 %v846_v52  ;;  %v847_v51 = vadd.f32 1.0, %v1746_v53  ;;  %v408_v49 = vpop.xlane.xlu0 %407 }
 0x18f   :  { %v1750_v10 = vpop.eup %1749  ;;  %1414 = vst [vmem:[%s3567_s3] sm:$0xff] %v1246_v26  ;;  %1416 = vst.msk [vmem:[%s3567_s3 + $0x8] sm:$0xff] %vm1415_vm1, %v1247_v3  ;;  %v1276_v63 = vmul.f32 %v1748_v40, %v1108_v14  ;;  %v1277_v60 = vmul.f32 %v1748_v40, %v1109_v15  ;;  %1769 = vpow2.f32 %v1615_v8  ;;  %v1616_v23 = vmul.f32 -1.442695, %v408_v49  ;;  %v1123_v14 = vld [vmem:[%s3566_s2 + $0x168] sm:$0xff]  ;;  %v1124_v40 = vld [vmem:[%s3566_s2 + $0x170] sm:$0xff] }
 0x190   :  { %v1752_v2 = vpop.eup %1751  ;;  %1771 = vrcp.f32 %v847_v51  ;;  %v848_v29 = vadd.f32 1.0, %v1750_v10  ;;  %v411_v48 = vpop.xlane.xlu1 %410 }
 0x191   :  { %v1754_v24 = vpop.eup %1753  ;;  %1445 = vst [vmem:[%s3567_s3 + $0xf0] sm:$0xff] %v1276_v63  ;;  %1446 = vst.msk [vmem:[%s3567_s3 + $0xf8] sm:$0xff] %vm1415_vm1, %v1277_v60  ;;  %v1278_v22 = vmul.f32 %v1752_v2, %v1110_v36  ;;  %v1279_v21 = vmul.f32 %v1752_v2, %v1111_v6  ;;  %1773 = vpow2.f32 %v1616_v23  ;;  %v1617_v1 = vmul.f32 -1.442695, %v411_v48  ;;  %v1125_v36 = vld [vmem:[%s3566_s2 + $0x178] sm:$0xff]  ;;  %v1126_v2 = vld [vmem:[%s3566_s2 + $0x180] sm:$0xff] }
 0x192   :  { %v1756_v58 = vpop.eup %1755  ;;  %1775 = vrcp.f32 %v848_v29  ;;  %v849_v17 = vadd.f32 1.0, %v1754_v24  ;;  %v414_v5 = vpop.xlane.xlu0 %413 }
 0x193   :  { %v1758_v54 = vpop.eup %1757  ;;  %1447 = vst [vmem:[%s3567_s3 + $0x100] sm:$0xff] %v1278_v22  ;;  %1448 = vst.msk [vmem:[%s3567_s3 + $0x108] sm:$0xff] %vm1415_vm1, %v1279_v21  ;;  %v1280_v7 = vmul.f32 %v1756_v58, %v1112_v27  ;;  %v1281_v61 = vmul.f32 %v1756_v58, %v1113_v12  ;;  %1777 = vpow2.f32 %v1617_v1  ;;  %v1618_v44 = vmul.f32 -1.442695, %v414_v5  ;;  %v1127_v27 = vld [vmem:[%s3566_s2 + $0x188] sm:$0xff]  ;;  %v1128_v58 = vld [vmem:[%s3566_s2 + $0x190] sm:$0xff] }
 0x194   :  { %v1760_v13 = vpop.eup %1759  ;;  %1779 = vrcp.f32 %v849_v17  ;;  %v850_v35 = vadd.f32 1.0, %v1758_v54  ;;  %v417_v50 = vpop.xlane.xlu1 %416 }
 0x195   :  { %v1762_v31 = vpop.eup %1761  ;;  %1449 = vst [vmem:[%s3567_s3 + $0x110] sm:$0xff] %v1280_v7  ;;  %1450 = vst.msk [vmem:[%s3567_s3 + $0x118] sm:$0xff] %vm1415_vm1, %v1281_v61  ;;  %v1282_v37 = vmul.f32 %v1760_v13, %v1114_v28  ;;  %v1283_v56 = vmul.f32 %v1760_v13, %v1115_v45  ;;  %1781 = vpow2.f32 %v1618_v44  ;;  %v1619_v39 = vmul.f32 -1.442695, %v417_v50  ;;  %v1129_v28 = vld [vmem:[%s3566_s2 + $0x198] sm:$0xff]  ;;  %v1130_v13 = vld [vmem:[%s3566_s2 + $0x1a0] sm:$0xff] }
 0x196   :  { %v1764_v62 = vpop.eup %1763  ;;  %1783 = vrcp.f32 %v850_v35  ;;  %v851_v41 = vadd.f32 1.0, %v1762_v31  ;;  %v420_v4 = vpop.xlane.xlu0 %419 }
 0x197   :  { %v1766_v59 = vpop.eup %1765  ;;  %1451 = vst [vmem:[%s3567_s3 + $0x120] sm:$0xff] %v1282_v37  ;;  %1452 = vst.msk [vmem:[%s3567_s3 + $0x128] sm:$0xff] %vm1415_vm1, %v1283_v56  ;;  %v1284_v19 = vmul.f32 %v1764_v62, %v1116_v42  ;;  %v1285_v43 = vmul.f32 %v1764_v62, %v1117_v34  ;;  %1785 = vpow2.f32 %v1619_v39  ;;  %v1620_v30 = vmul.f32 -1.442695, %v420_v4  ;;  %v1131_v42 = vld [vmem:[%s3566_s2 + $0x1a8] sm:$0xff]  ;;  %v1132_v62 = vld [vmem:[%s3566_s2 + $0x1b0] sm:$0xff] }
 0x198   :  { %v1768_v16 = vpop.eup %1767  ;;  %1787 = vrcp.f32 %v851_v41  ;;  %v852_v32 = vadd.f32 1.0, %v1766_v59  ;;  %v423_v0 = vpop.xlane.xlu1 %422 }
 0x199   :  { %v1770_v25 = vpop.eup %1769  ;;  %1453 = vst [vmem:[%s3567_s3 + $0x130] sm:$0xff] %v1284_v19  ;;  %1454 = vst.msk [vmem:[%s3567_s3 + $0x138] sm:$0xff] %vm1415_vm1, %v1285_v43  ;;  %v1286_v38 = vmul.f32 %v1768_v16, %v1118_v11  ;;  %v1287_v55 = vmul.f32 %v1768_v16, %v1119_v18  ;;  %1789 = vpow2.f32 %v1620_v30  ;;  %v1621_v33 = vmul.f32 -1.442695, %v423_v0  ;;  %v1133_v11 = vld [vmem:[%s3566_s2 + $0x1b8] sm:$0xff]  ;;  %v1134_v16 = vld [vmem:[%s3566_s2 + $0x1c0] sm:$0xff] }
 0x19a   :  { %v1772_v9 = vpop.eup %1771  ;;  %1791 = vrcp.f32 %v852_v32  ;;  %v853_v15 = vadd.f32 1.0, %v1770_v25  ;;  %v426_v52 = vpop.xlane.xlu0 %425 }
 0x19b   :  { %v1774_v20 = vpop.eup %1773  ;;  %1455 = vst [vmem:[%s3567_s3 + $0x140] sm:$0xff] %v1286_v38  ;;  %1456 = vst.msk [vmem:[%s3567_s3 + $0x148] sm:$0xff] %vm1415_vm1, %v1287_v55  ;;  %v1288_v53 = vmul.f32 %v1772_v9, %v1120_v47  ;;  %v1289_v26 = vmul.f32 %v1772_v9, %v1121_v57  ;;  %1793 = vpow2.f32 %v1621_v33  ;;  %v1622_v3 = vmul.f32 -1.442695, %v426_v52  ;;  %v1135_v47 = vld [vmem:[%s3566_s2 + $0x1c8] sm:$0xff]  ;;  %v1136_v9 = vld [vmem:[%s3566_s2 + $0x1d0] sm:$0xff] }
 0x19c   :  { %v1776_v8 = vpop.eup %1775  ;;  %1795 = vrcp.f32 %v853_v15  ;;  %v854_v6 = vadd.f32 1.0, %v1774_v20  ;;  %v429_v51 = vpop.xlane.xlu1 %428 }
 0x19d   :  { %v1778_v49 = vpop.eup %1777  ;;  %1457 = vst [vmem:[%s3567_s3 + $0x150] sm:$0xff] %v1288_v53  ;;  %1458 = vst.msk [vmem:[%s3567_s3 + $0x158] sm:$0xff] %vm1415_vm1, %v1289_v26  ;;  %v1290_v10 = vmul.f32 %v1776_v8, %v1122_v46  ;;  %v1291_v63 = vmul.f32 %v1776_v8, %v1123_v14  ;;  %1797 = vpow2.f32 %v1622_v3  ;;  %v1623_v60 = vmul.f32 -1.442695, %v429_v51  ;;  %v1137_v46 = vld [vmem:[%s3566_s2 + $0x1d8] sm:$0xff]  ;;  %v1138_v8 = vld [vmem:[%s3566_s2 + $0x1e0] sm:$0xff] }
 0x19e   :  { %v1780_v23 = vpop.eup %1779  ;;  %1799 = vrcp.f32 %v854_v6  ;;  %v855_v12 = vadd.f32 1.0, %v1778_v49  ;;  %v432_v29 = vpop.xlane.xlu0 %431 }
 0x19f   :  { %v1782_v48 = vpop.eup %1781  ;;  %1459 = vst [vmem:[%s3567_s3 + $0x160] sm:$0xff] %v1290_v10  ;;  %1460 = vst.msk [vmem:[%s3567_s3 + $0x168] sm:$0xff] %vm1415_vm1, %v1291_v63  ;;  %v1292_v24 = vmul.f32 %v1780_v23, %v1124_v40  ;;  %v1293_v22 = vmul.f32 %v1780_v23, %v1125_v36  ;;  %1801 = vpow2.f32 %v1623_v60  ;;  %v1624_v21 = vmul.f32 -1.442695, %v432_v29  ;;  %v1139_v40 = vld [vmem:[%s3566_s2 + $0x1e8] sm:$0xff]  ;;  %v1140_v23 = vld [vmem:[%s3566_s2 + $0x1f0] sm:$0xff] }
 0x1a0   :  { %v1784_v1 = vpop.eup %1783  ;;  %1803 = vrcp.f32 %v855_v12  ;;  %v856_v45 = vadd.f32 1.0, %v1782_v48  ;;  %v435_v17 = vpop.xlane.xlu1 %434 }
 0x1a1   :  { %v1786_v5 = vpop.eup %1785  ;;  %1461 = vst [vmem:[%s3567_s3 + $0x170] sm:$0xff] %v1292_v24  ;;  %1462 = vst.msk [vmem:[%s3567_s3 + $0x178] sm:$0xff] %vm1415_vm1, %v1293_v22  ;;  %v1294_v54 = vmul.f32 %v1784_v1, %v1126_v2  ;;  %v1295_v7 = vmul.f32 %v1784_v1, %v1127_v27  ;;  %1805 = vpow2.f32 %v1624_v21  ;;  %v1625_v61 = vmul.f32 -1.442695, %v435_v17  ;;  %v1141_v2 = vld [vmem:[%s3566_s2 + $0x1f8] sm:$0xff]  ;;  %v1142_v1 = vld [vmem:[%s3566_s2 + $0x200] sm:$0xff] }
 0x1a2   :  { %v1788_v44 = vpop.eup %1787  ;;  %1807 = vrcp.f32 %v856_v45  ;;  %v857_v34 = vadd.f32 1.0, %v1786_v5  ;;  %v438_v35 = vpop.xlane.xlu0 %437 }
 0x1a3   :  { %v1790_v50 = vpop.eup %1789  ;;  %1463 = vst [vmem:[%s3567_s3 + $0x180] sm:$0xff] %v1294_v54  ;;  %1464 = vst.msk [vmem:[%s3567_s3 + $0x188] sm:$0xff] %vm1415_vm1, %v1295_v7  ;;  %v1296_v31 = vmul.f32 %v1788_v44, %v1128_v58  ;;  %v1297_v37 = vmul.f32 %v1788_v44, %v1129_v28  ;;  %1809 = vpow2.f32 %v1625_v61  ;;  %v1626_v56 = vmul.f32 -1.442695, %v438_v35  ;;  %v1143_v58 = vld [vmem:[%s3566_s2 + $0x208] sm:$0xff]  ;;  %v1144_v44 = vld [vmem:[%s3566_s2 + $0x210] sm:$0xff] }
 0x1a4   :  { %v1792_v39 = vpop.eup %1791  ;;  %1811 = vrcp.f32 %v857_v34  ;;  %v858_v18 = vadd.f32 1.0, %v1790_v50  ;;  %v441_v41 = vpop.xlane.xlu1 %440 }
 0x1a5   :  { %v1794_v4 = vpop.eup %1793  ;;  %1465 = vst [vmem:[%s3567_s3 + $0x190] sm:$0xff] %v1296_v31  ;;  %1466 = vst.msk [vmem:[%s3567_s3 + $0x198] sm:$0xff] %vm1415_vm1, %v1297_v37  ;;  %v1298_v59 = vmul.f32 %v1792_v39, %v1130_v13  ;;  %v1299_v19 = vmul.f32 %v1792_v39, %v1131_v42  ;;  %1813 = vpow2.f32 %v1626_v56  ;;  %v1627_v43 = vmul.f32 -1.442695, %v441_v41  ;;  %v1145_v13 = vld [vmem:[%s3566_s2 + $0x218] sm:$0xff]  ;;  %v1146_v39 = vld [vmem:[%s3566_s2 + $0x220] sm:$0xff] }
 0x1a6   :  { %v1796_v30 = vpop.eup %1795  ;;  %1815 = vrcp.f32 %v858_v18  ;;  %v859_v57 = vadd.f32 1.0, %v1794_v4  ;;  %v444_v32 = vpop.xlane.xlu0 %443 }
 0x1a7   :  { %v1798_v0 = vpop.eup %1797  ;;  %1467 = vst [vmem:[%s3567_s3 + $0x1a0] sm:$0xff] %v1298_v59  ;;  %1468 = vst.msk [vmem:[%s3567_s3 + $0x1a8] sm:$0xff] %vm1415_vm1, %v1299_v19  ;;  %v1300_v25 = vmul.f32 %v1796_v30, %v1132_v62  ;;  %v1301_v38 = vmul.f32 %v1796_v30, %v1133_v11  ;;  %1817 = vpow2.f32 %v1627_v43  ;;  %v1628_v55 = vmul.f32 -1.442695, %v444_v32  ;;  %v1147_v62 = vld [vmem:[%s3566_s2 + $0x228] sm:$0xff]  ;;  %v1148_v30 = vld [vmem:[%s3566_s2 + $0x230] sm:$0xff] }
 0x1a8   :  { %v1800_v33 = vpop.eup %1799  ;;  %1819 = vrcp.f32 %v859_v57  ;;  %v860_v14 = vadd.f32 1.0, %v1798_v0  ;;  %v447_v15 = vpop.xlane.xlu1 %446 }
 0x1a9   :  { %v1802_v52 = vpop.eup %1801  ;;  %1469 = vst [vmem:[%s3567_s3 + $0x1b0] sm:$0xff] %v1300_v25  ;;  %1470 = vst.msk [vmem:[%s3567_s3 + $0x1b8] sm:$0xff] %vm1415_vm1, %v1301_v38  ;;  %v1302_v20 = vmul.f32 %v1800_v33, %v1134_v16  ;;  %v1303_v53 = vmul.f32 %v1800_v33, %v1135_v47  ;;  %1821 = vpow2.f32 %v1628_v55  ;;  %v1629_v26 = vmul.f32 -1.442695, %v447_v15  ;;  %v1149_v16 = vld [vmem:[%s3566_s2 + $0x238] sm:$0xff]  ;;  %v1150_v33 = vld [vmem:[%s3566_s2 + $0x240] sm:$0xff] }
 0x1aa   :  { %v1804_v3 = vpop.eup %1803  ;;  %1823 = vrcp.f32 %v860_v14  ;;  %v861_v36 = vadd.f32 1.0, %v1802_v52  ;;  %v450_v6 = vpop.xlane.xlu0 %449 }
 0x1ab   :  { %v1806_v51 = vpop.eup %1805  ;;  %1471 = vst [vmem:[%s3567_s3 + $0x1c0] sm:$0xff] %v1302_v20  ;;  %1472 = vst.msk [vmem:[%s3567_s3 + $0x1c8] sm:$0xff] %vm1415_vm1, %v1303_v53  ;;  %v1304_v49 = vmul.f32 %v1804_v3, %v1136_v9  ;;  %v1305_v10 = vmul.f32 %v1804_v3, %v1137_v46  ;;  %1825 = vpow2.f32 %v1629_v26  ;;  %v1630_v63 = vmul.f32 -1.442695, %v450_v6  ;;  %v1151_v9 = vld [vmem:[%s3566_s2 + $0x248] sm:$0xff]  ;;  %v1152_v3 = vld [vmem:[%s3566_s2 + $0x250] sm:$0xff] }
 0x1ac   :  { %v1808_v60 = vpop.eup %1807  ;;  %1827 = vrcp.f32 %v861_v36  ;;  %v862_v27 = vadd.f32 1.0, %v1806_v51  ;;  %v453_v12 = vpop.xlane.xlu1 %452 }
 0x1ad   :  { %v1810_v29 = vpop.eup %1809  ;;  %1473 = vst [vmem:[%s3567_s3 + $0x1d0] sm:$0xff] %v1304_v49  ;;  %1474 = vst.msk [vmem:[%s3567_s3 + $0x1d8] sm:$0xff] %vm1415_vm1, %v1305_v10  ;;  %v1306_v48 = vmul.f32 %v1808_v60, %v1138_v8  ;;  %v1307_v24 = vmul.f32 %v1808_v60, %v1139_v40  ;;  %1829 = vpow2.f32 %v1630_v63  ;;  %v1631_v22 = vmul.f32 -1.442695, %v453_v12  ;;  %v1153_v8 = vld [vmem:[%s3566_s2 + $0x258] sm:$0xff]  ;;  %v1154_v60 = vld [vmem:[%s3566_s2 + $0x260] sm:$0xff] }
 0x1ae   :  { %v1812_v21 = vpop.eup %1811  ;;  %1831 = vrcp.f32 %v862_v27  ;;  %v863_v28 = vadd.f32 1.0, %v1810_v29  ;;  %v456_v45 = vpop.xlane.xlu0 %455 }
 0x1af   :  { %v1814_v17 = vpop.eup %1813  ;;  %1475 = vst [vmem:[%s3567_s3 + $0x1e0] sm:$0xff] %v1306_v48  ;;  %1476 = vst.msk [vmem:[%s3567_s3 + $0x1e8] sm:$0xff] %vm1415_vm1, %v1307_v24  ;;  %v1308_v5 = vmul.f32 %v1812_v21, %v1140_v23  ;;  %v1309_v54 = vmul.f32 %v1812_v21, %v1141_v2  ;;  %1833 = vpow2.f32 %v1631_v22  ;;  %v1632_v7 = vmul.f32 -1.442695, %v456_v45  ;;  %v1155_v23 = vld [vmem:[%s3566_s2 + $0x268] sm:$0xff]  ;;  %v1156_v21 = vld [vmem:[%s3566_s2 + $0x270] sm:$0xff] }
 0x1b0   :  { %v1816_v61 = vpop.eup %1815  ;;  %1835 = vrcp.f32 %v863_v28  ;;  %v864_v42 = vadd.f32 1.0, %v1814_v17  ;;  %v459_v34 = vpop.xlane.xlu1 %458 }
 0x1b1   :  { %v1818_v35 = vpop.eup %1817  ;;  %1477 = vst [vmem:[%s3567_s3 + $0x1f0] sm:$0xff] %v1308_v5  ;;  %1478 = vst.msk [vmem:[%s3567_s3 + $0x1f8] sm:$0xff] %vm1415_vm1, %v1309_v54  ;;  %v1310_v50 = vmul.f32 %v1816_v61, %v1142_v1  ;;  %v1311_v31 = vmul.f32 %v1816_v61, %v1143_v58  ;;  %1837 = vpow2.f32 %v1632_v7  ;;  %v1633_v37 = vmul.f32 -1.442695, %v459_v34  ;;  %v1157_v1 = vld [vmem:[%s3566_s2 + $0x278] sm:$0xff]  ;;  %v1158_v61 = vld [vmem:[%s3566_s2 + $0x280] sm:$0xff] }
 0x1b2   :  { %v1820_v56 = vpop.eup %1819  ;;  %1839 = vrcp.f32 %v864_v42  ;;  %v865_v11 = vadd.f32 1.0, %v1818_v35  ;;  %v462_v18 = vpop.xlane.xlu0 %461 }
 0x1b3   :  { %v1822_v41 = vpop.eup %1821  ;;  %1479 = vst [vmem:[%s3567_s3 + $0x200] sm:$0xff] %v1310_v50  ;;  %1480 = vst.msk [vmem:[%s3567_s3 + $0x208] sm:$0xff] %vm1415_vm1, %v1311_v31  ;;  %v1312_v4 = vmul.f32 %v1820_v56, %v1144_v44  ;;  %v1313_v59 = vmul.f32 %v1820_v56, %v1145_v13  ;;  %1841 = vpow2.f32 %v1633_v37  ;;  %v1634_v19 = vmul.f32 -1.442695, %v462_v18  ;;  %v1159_v44 = vld [vmem:[%s3566_s2 + $0x288] sm:$0xff]  ;;  %v1160_v56 = vld [vmem:[%s3566_s2 + $0x290] sm:$0xff] }
 0x1b4   :  { %v1824_v43 = vpop.eup %1823  ;;  %1843 = vrcp.f32 %v865_v11  ;;  %v866_v47 = vadd.f32 1.0, %v1822_v41  ;;  %v465_v57 = vpop.xlane.xlu1 %464 }
 0x1b5   :  { %v1826_v32 = vpop.eup %1825  ;;  %1481 = vst [vmem:[%s3567_s3 + $0x210] sm:$0xff] %v1312_v4  ;;  %1482 = vst.msk [vmem:[%s3567_s3 + $0x218] sm:$0xff] %vm1415_vm1, %v1313_v59  ;;  %v1314_v0 = vmul.f32 %v1824_v43, %v1146_v39  ;;  %v1315_v25 = vmul.f32 %v1824_v43, %v1147_v62  ;;  %1845 = vpow2.f32 %v1634_v19  ;;  %v1635_v38 = vmul.f32 -1.442695, %v465_v57  ;;  %v1161_v39 = vld [vmem:[%s3566_s2 + $0x298] sm:$0xff]  ;;  %v1162_v43 = vld [vmem:[%s3566_s2 + $0x2a0] sm:$0xff] }
 0x1b6   :  { %v1828_v55 = vpop.eup %1827  ;;  %1847 = vrcp.f32 %v866_v47  ;;  %v867_v46 = vadd.f32 1.0, %v1826_v32  ;;  %v468_v14 = vpop.xlane.xlu0 %467 }
 0x1b7   :  { %v1830_v15 = vpop.eup %1829  ;;  %1483 = vst [vmem:[%s3567_s3 + $0x220] sm:$0xff] %v1314_v0  ;;  %1484 = vst.msk [vmem:[%s3567_s3 + $0x228] sm:$0xff] %vm1415_vm1, %v1315_v25  ;;  %v1316_v52 = vmul.f32 %v1828_v55, %v1148_v30  ;;  %v1317_v20 = vmul.f32 %v1828_v55, %v1149_v16  ;;  %1849 = vpow2.f32 %v1635_v38  ;;  %v1636_v53 = vmul.f32 -1.442695, %v468_v14  ;;  %v1163_v30 = vld [vmem:[%s3566_s2 + $0x2a8] sm:$0xff]  ;;  %v1164_v55 = vld [vmem:[%s3566_s2 + $0x2b0] sm:$0xff] }
 0x1b8   :  { %v1832_v26 = vpop.eup %1831  ;;  %1851 = vrcp.f32 %v867_v46  ;;  %v868_v40 = vadd.f32 1.0, %v1830_v15  ;;  %v471_v36 = vpop.xlane.xlu1 %470 }
 0x1b9   :  { %v1834_v6 = vpop.eup %1833  ;;  %1485 = vst [vmem:[%s3567_s3 + $0x230] sm:$0xff] %v1316_v52  ;;  %1486 = vst.msk [vmem:[%s3567_s3 + $0x238] sm:$0xff] %vm1415_vm1, %v1317_v20  ;;  %v1318_v51 = vmul.f32 %v1832_v26, %v1150_v33  ;;  %v1319_v49 = vmul.f32 %v1832_v26, %v1151_v9  ;;  %1853 = vpow2.f32 %v1636_v53  ;;  %v1637_v10 = vmul.f32 -1.442695, %v471_v36  ;;  %v1165_v33 = vld [vmem:[%s3566_s2 + $0x2b8] sm:$0xff]  ;;  %v1166_v26 = vld [vmem:[%s3566_s2 + $0x2c0] sm:$0xff] }
 0x1ba   :  { %v1836_v63 = vpop.eup %1835  ;;  %1855 = vrcp.f32 %v868_v40  ;;  %v869_v2 = vadd.f32 1.0, %v1834_v6  ;;  %v474_v27 = vpop.xlane.xlu0 %473 }
 0x1bb   :  { %v1838_v12 = vpop.eup %1837  ;;  %1487 = vst [vmem:[%s3567_s3 + $0x240] sm:$0xff] %v1318_v51  ;;  %1488 = vst.msk [vmem:[%s3567_s3 + $0x248] sm:$0xff] %vm1415_vm1, %v1319_v49  ;;  %v1320_v29 = vmul.f32 %v1836_v63, %v1152_v3  ;;  %v1321_v48 = vmul.f32 %v1836_v63, %v1153_v8  ;;  %1857 = vpow2.f32 %v1637_v10  ;;  %v1638_v24 = vmul.f32 -1.442695, %v474_v27  ;;  %v1167_v3 = vld [vmem:[%s3566_s2 + $0x2c8] sm:$0xff]  ;;  %v1168_v63 = vld [vmem:[%s3566_s2 + $0x2d0] sm:$0xff] }
 0x1bc   :  { %v1840_v22 = vpop.eup %1839  ;;  %1859 = vrcp.f32 %v869_v2  ;;  %v870_v58 = vadd.f32 1.0, %v1838_v12  ;;  %v477_v28 = vpop.xlane.xlu1 %476 }
 0x1bd   :  { %v1842_v45 = vpop.eup %1841  ;;  %1489 = vst [vmem:[%s3567_s3 + $0x250] sm:$0xff] %v1320_v29  ;;  %1490 = vst.msk [vmem:[%s3567_s3 + $0x258] sm:$0xff] %vm1415_vm1, %v1321_v48  ;;  %v1322_v17 = vmul.f32 %v1840_v22, %v1154_v60  ;;  %v1323_v5 = vmul.f32 %v1840_v22, %v1155_v23  ;;  %1861 = vpow2.f32 %v1638_v24  ;;  %v1639_v54 = vmul.f32 -1.442695, %v477_v28  ;;  %v1169_v60 = vld [vmem:[%s3566_s2 + $0x2d8] sm:$0xff]  ;;  %v1170_v22 = vld [vmem:[%s3566_s2 + $0x2e0] sm:$0xff] }
 0x1be   :  { %v1844_v7 = vpop.eup %1843  ;;  %1863 = vrcp.f32 %v870_v58  ;;  %v871_v13 = vadd.f32 1.0, %v1842_v45  ;;  %v480_v42 = vpop.xlane.xlu0 %479 }
 0x1bf   :  { %v1846_v34 = vpop.eup %1845  ;;  %1491 = vst [vmem:[%s3567_s3 + $0x260] sm:$0xff] %v1322_v17  ;;  %1492 = vst.msk [vmem:[%s3567_s3 + $0x268] sm:$0xff] %vm1415_vm1, %v1323_v5  ;;  %v1324_v35 = vmul.f32 %v1844_v7, %v1156_v21  ;;  %v1325_v50 = vmul.f32 %v1844_v7, %v1157_v1  ;;  %1865 = vpow2.f32 %v1639_v54  ;;  %v1640_v31 = vmul.f32 -1.442695, %v480_v42  ;;  %v1171_v21 = vld [vmem:[%s3566_s2 + $0x2e8] sm:$0xff]  ;;  %v1172_v7 = vld [vmem:[%s3566_s2 + $0x2f0] sm:$0xff] }
 0x1c0   :  { %v1848_v37 = vpop.eup %1847  ;;  %1867 = vrcp.f32 %v871_v13  ;;  %v872_v62 = vadd.f32 1.0, %v1846_v34  ;;  %v483_v11 = vpop.xlane.xlu1 %482 }
 0x1c1   :  { %v1850_v18 = vpop.eup %1849  ;;  %1493 = vst [vmem:[%s3567_s3 + $0x270] sm:$0xff] %v1324_v35  ;;  %1494 = vst.msk [vmem:[%s3567_s3 + $0x278] sm:$0xff] %vm1415_vm1, %v1325_v50  ;;  %v1326_v41 = vmul.f32 %v1848_v37, %v1158_v61  ;;  %v1327_v4 = vmul.f32 %v1848_v37, %v1159_v44  ;;  %1869 = vpow2.f32 %v1640_v31  ;;  %v1641_v59 = vmul.f32 -1.442695, %v483_v11  ;;  %v1173_v61 = vld [vmem:[%s3566_s2 + $0x2f8] sm:$0xff]  ;;  %v1174_v37 = vld [vmem:[%s3566_s2 + $0x300] sm:$0xff] }
 0x1c2   :  { %v1852_v19 = vpop.eup %1851  ;;  %1871 = vrcp.f32 %v872_v62  ;;  %v873_v16 = vadd.f32 1.0, %v1850_v18  ;;  %v486_v47 = vpop.xlane.xlu0 %485 }
 0x1c3   :  { %v1854_v57 = vpop.eup %1853  ;;  %1495 = vst [vmem:[%s3567_s3 + $0x280] sm:$0xff] %v1326_v41  ;;  %1496 = vst.msk [vmem:[%s3567_s3 + $0x288] sm:$0xff] %vm1415_vm1, %v1327_v4  ;;  %v1328_v32 = vmul.f32 %v1852_v19, %v1160_v56  ;;  %v1329_v0 = vmul.f32 %v1852_v19, %v1161_v39  ;;  %1873 = vpow2.f32 %v1641_v59  ;;  %v1642_v25 = vmul.f32 -1.442695, %v486_v47  ;;  %v1175_v56 = vld [vmem:[%s3566_s2 + $0x308] sm:$0xff]  ;;  %v1176_v19 = vld [vmem:[%s3566_s2 + $0x310] sm:$0xff] }
 0x1c4   :  { %v1856_v38 = vpop.eup %1855  ;;  %1875 = vrcp.f32 %v873_v16  ;;  %v874_v9 = vadd.f32 1.0, %v1854_v57  ;;  %v489_v46 = vpop.xlane.xlu1 %488 }
 0x1c5   :  { %v1858_v14 = vpop.eup %1857  ;;  %1497 = vst [vmem:[%s3567_s3 + $0x290] sm:$0xff] %v1328_v32  ;;  %1498 = vst.msk [vmem:[%s3567_s3 + $0x298] sm:$0xff] %vm1415_vm1, %v1329_v0  ;;  %v1330_v15 = vmul.f32 %v1856_v38, %v1162_v43  ;;  %v1331_v52 = vmul.f32 %v1856_v38, %v1163_v30  ;;  %1877 = vpow2.f32 %v1642_v25  ;;  %v1643_v20 = vmul.f32 -1.442695, %v489_v46  ;;  %v1177_v43 = vld [vmem:[%s3566_s2 + $0x318] sm:$0xff]  ;;  %v1178_v38 = vld [vmem:[%s3566_s2 + $0x320] sm:$0xff] }
 0x1c6   :  { %v1860_v53 = vpop.eup %1859  ;;  %1879 = vrcp.f32 %v874_v9  ;;  %v875_v8 = vadd.f32 1.0, %v1858_v14  ;;  %v492_v40 = vpop.xlane.xlu0 %491 }
 0x1c7   :  { %v1862_v36 = vpop.eup %1861  ;;  %1499 = vst [vmem:[%s3567_s3 + $0x2a0] sm:$0xff] %v1330_v15  ;;  %1500 = vst.msk [vmem:[%s3567_s3 + $0x2a8] sm:$0xff] %vm1415_vm1, %v1331_v52  ;;  %v1332_v6 = vmul.f32 %v1860_v53, %v1164_v55  ;;  %v1333_v51 = vmul.f32 %v1860_v53, %v1165_v33  ;;  %1881 = vpow2.f32 %v1643_v20  ;;  %v1644_v49 = vmul.f32 -1.442695, %v492_v40  ;;  %v1179_v55 = vld [vmem:[%s3566_s2 + $0x328] sm:$0xff]  ;;  %v1180_v53 = vld [vmem:[%s3566_s2 + $0x330] sm:$0xff] }
 0x1c8   :  { %v1864_v10 = vpop.eup %1863  ;;  %1883 = vrcp.f32 %v875_v8  ;;  %v876_v23 = vadd.f32 1.0, %v1862_v36  ;;  %v495_v2 = vpop.xlane.xlu1 %494 }
 0x1c9   :  { %v1866_v27 = vpop.eup %1865  ;;  %1501 = vst [vmem:[%s3567_s3 + $0x2b0] sm:$0xff] %v1332_v6  ;;  %1502 = vst.msk [vmem:[%s3567_s3 + $0x2b8] sm:$0xff] %vm1415_vm1, %v1333_v51  ;;  %v1334_v12 = vmul.f32 %v1864_v10, %v1166_v26  ;;  %v1335_v29 = vmul.f32 %v1864_v10, %v1167_v3  ;;  %1885 = vpow2.f32 %v1644_v49  ;;  %v1645_v48 = vmul.f32 -1.442695, %v495_v2  ;;  %v1181_v26 = vld [vmem:[%s3566_s2 + $0x338] sm:$0xff]  ;;  %v1182_v10 = vld [vmem:[%s3566_s2 + $0x340] sm:$0xff] }
 0x1ca   :  { %v1868_v24 = vpop.eup %1867  ;;  %1887 = vrcp.f32 %v876_v23  ;;  %v877_v1 = vadd.f32 1.0, %v1866_v27  ;;  %v498_v58 = vpop.xlane.xlu0 %497 }
 0x1cb   :  { %v1870_v28 = vpop.eup %1869  ;;  %1503 = vst [vmem:[%s3567_s3 + $0x2c0] sm:$0xff] %v1334_v12  ;;  %1504 = vst.msk [vmem:[%s3567_s3 + $0x2c8] sm:$0xff] %vm1415_vm1, %v1335_v29  ;;  %v1336_v45 = vmul.f32 %v1868_v24, %v1168_v63  ;;  %v1337_v17 = vmul.f32 %v1868_v24, %v1169_v60  ;;  %1889 = vpow2.f32 %v1645_v48  ;;  %v1646_v5 = vmul.f32 -1.442695, %v498_v58  ;;  %v1183_v63 = vld [vmem:[%s3566_s2 + $0x348] sm:$0xff]  ;;  %v1184_v24 = vld [vmem:[%s3566_s2 + $0x350] sm:$0xff] }
 0x1cc   :  { %v1872_v54 = vpop.eup %1871  ;;  %1891 = vrcp.f32 %v877_v1  ;;  %v878_v44 = vadd.f32 1.0, %v1870_v28  ;;  %v501_v13 = vpop.xlane.xlu1 %500 }
 0x1cd   :  { %v1874_v42 = vpop.eup %1873  ;;  %1505 = vst [vmem:[%s3567_s3 + $0x2d0] sm:$0xff] %v1336_v45  ;;  %1506 = vst.msk [vmem:[%s3567_s3 + $0x2d8] sm:$0xff] %vm1415_vm1, %v1337_v17  ;;  %v1338_v34 = vmul.f32 %v1872_v54, %v1170_v22  ;;  %v1339_v35 = vmul.f32 %v1872_v54, %v1171_v21  ;;  %1893 = vpow2.f32 %v1646_v5  ;;  %v1647_v50 = vmul.f32 -1.442695, %v501_v13  ;;  %v1185_v22 = vld [vmem:[%s3566_s2 + $0x358] sm:$0xff]  ;;  %v1186_v54 = vld [vmem:[%s3566_s2 + $0x360] sm:$0xff] }
 0x1ce   :  { %v1876_v31 = vpop.eup %1875  ;;  %1895 = vrcp.f32 %v878_v44  ;;  %v879_v39 = vadd.f32 1.0, %v1874_v42  ;;  %v504_v62 = vpop.xlane.xlu0 %503 }
 0x1cf   :  { %v1878_v11 = vpop.eup %1877  ;;  %1507 = vst [vmem:[%s3567_s3 + $0x2e0] sm:$0xff] %v1338_v34  ;;  %1508 = vst.msk [vmem:[%s3567_s3 + $0x2e8] sm:$0xff] %vm1415_vm1, %v1339_v35  ;;  %v1340_v18 = vmul.f32 %v1876_v31, %v1172_v7  ;;  %v1341_v41 = vmul.f32 %v1876_v31, %v1173_v61  ;;  %1897 = vpow2.f32 %v1647_v50  ;;  %v1648_v4 = vmul.f32 -1.442695, %v504_v62  ;;  %v1187_v7 = vld [vmem:[%s3566_s2 + $0x368] sm:$0xff]  ;;  %v1188_v31 = vld [vmem:[%s3566_s2 + $0x370] sm:$0xff] }
 0x1d0   :  { %v1880_v59 = vpop.eup %1879  ;;  %1899 = vrcp.f32 %v879_v39  ;;  %v880_v30 = vadd.f32 1.0, %v1878_v11  ;;  %v507_v16 = vpop.xlane.xlu1 %506 }
 0x1d1   :  { %v1882_v47 = vpop.eup %1881  ;;  %1509 = vst [vmem:[%s3567_s3 + $0x2f0] sm:$0xff] %v1340_v18  ;;  %1510 = vst.msk [vmem:[%s3567_s3 + $0x2f8] sm:$0xff] %vm1415_vm1, %v1341_v41  ;;  %v1342_v57 = vmul.f32 %v1880_v59, %v1174_v37  ;;  %v1343_v32 = vmul.f32 %v1880_v59, %v1175_v56  ;;  %1901 = vpow2.f32 %v1648_v4  ;;  %v1649_v0 = vmul.f32 -1.442695, %v507_v16  ;;  %v1189_v37 = vld [vmem:[%s3566_s2 + $0x378] sm:$0xff]  ;;  %v1190_v59 = vld [vmem:[%s3566_s2 + $0x380] sm:$0xff] }
 0x1d2   :  { %v1884_v25 = vpop.eup %1883  ;;  %1903 = vrcp.f32 %v880_v30  ;;  %v881_v33 = vadd.f32 1.0, %v1882_v47  ;;  %v510_v9 = vpop.xlane.xlu0 %509 }
 0x1d3   :  { %v1886_v46 = vpop.eup %1885  ;;  %1511 = vst [vmem:[%s3567_s3 + $0x300] sm:$0xff] %v1342_v57  ;;  %1512 = vst.msk [vmem:[%s3567_s3 + $0x308] sm:$0xff] %vm1415_vm1, %v1343_v32  ;;  %v1344_v14 = vmul.f32 %v1884_v25, %v1176_v19  ;;  %v1345_v15 = vmul.f32 %v1884_v25, %v1177_v43  ;;  %1905 = vpow2.f32 %v1649_v0  ;;  %v1650_v52 = vmul.f32 -1.442695, %v510_v9  ;;  %v1191_v19 = vld [vmem:[%s3566_s2 + $0x388] sm:$0xff]  ;;  %v1192_v25 = vld [vmem:[%s3566_s2 + $0x390] sm:$0xff] }
 0x1d4   :  { %v1888_v20 = vpop.eup %1887  ;;  %1907 = vrcp.f32 %v881_v33  ;;  %v882_v3 = vadd.f32 1.0, %v1886_v46  ;;  %v513_v8 = vpop.xlane.xlu1 %512 }
 0x1d5   :  { %v1890_v40 = vpop.eup %1889  ;;  %1513 = vst [vmem:[%s3567_s3 + $0x310] sm:$0xff] %v1344_v14  ;;  %1514 = vst.msk [vmem:[%s3567_s3 + $0x318] sm:$0xff] %vm1415_vm1, %v1345_v15  ;;  %v1346_v36 = vmul.f32 %v1888_v20, %v1178_v38  ;;  %v1347_v6 = vmul.f32 %v1888_v20, %v1179_v55  ;;  %1909 = vpow2.f32 %v1650_v52  ;;  %v1651_v51 = vmul.f32 -1.442695, %v513_v8  ;;  %v1193_v38 = vld [vmem:[%s3566_s2 + $0x398] sm:$0xff]  ;;  %v1194_v20 = vld [vmem:[%s3566_s2 + $0x3a0] sm:$0xff] }
 0x1d6   :  { %v1892_v49 = vpop.eup %1891  ;;  %1911 = vrcp.f32 %v882_v3  ;;  %v883_v60 = vadd.f32 1.0, %v1890_v40  ;;  %v516_v23 = vpop.xlane.xlu0 %515 }
 0x1d7   :  { %v1894_v2 = vpop.eup %1893  ;;  %1515 = vst [vmem:[%s3567_s3 + $0x320] sm:$0xff] %v1346_v36  ;;  %1516 = vst.msk [vmem:[%s3567_s3 + $0x328] sm:$0xff] %vm1415_vm1, %v1347_v6  ;;  %v1348_v27 = vmul.f32 %v1892_v49, %v1180_v53  ;;  %v1349_v12 = vmul.f32 %v1892_v49, %v1181_v26  ;;  %1913 = vpow2.f32 %v1651_v51  ;;  %v1652_v29 = vmul.f32 -1.442695, %v516_v23  ;;  %v1195_v53 = vld [vmem:[%s3566_s2 + $0x3a8] sm:$0xff]  ;;  %v1196_v49 = vld [vmem:[%s3566_s2 + $0x3b0] sm:$0xff] }
 0x1d8   :  { %v1896_v48 = vpop.eup %1895  ;;  %1915 = vrcp.f32 %v883_v60  ;;  %v884_v21 = vadd.f32 1.0, %v1894_v2  ;;  %v519_v1 = vpop.xlane.xlu1 %518 }
 0x1d9   :  { %v1898_v58 = vpop.eup %1897  ;;  %1517 = vst [vmem:[%s3567_s3 + $0x330] sm:$0xff] %v1348_v27  ;;  %1518 = vst.msk [vmem:[%s3567_s3 + $0x338] sm:$0xff] %vm1415_vm1, %v1349_v12  ;;  %v1350_v28 = vmul.f32 %v1896_v48, %v1182_v10  ;;  %v1351_v45 = vmul.f32 %v1896_v48, %v1183_v63  ;;  %1917 = vpow2.f32 %v1652_v29  ;;  %v1653_v17 = vmul.f32 -1.442695, %v519_v1  ;;  %v1197_v10 = vld [vmem:[%s3566_s2 + $0x3b8] sm:$0xff]  ;;  %v1198_v48 = vld [vmem:[%s3566_s2 + $0x3c0] sm:$0xff] }
 0x1da   :  { %v1900_v5 = vpop.eup %1899  ;;  %1919 = vrcp.f32 %v884_v21  ;;  %v885_v61 = vadd.f32 1.0, %v1898_v58  ;;  %v522_v44 = vpop.xlane.xlu0 %521 }
 0x1db   :  { %v1902_v13 = vpop.eup %1901  ;;  %1519 = vst [vmem:[%s3567_s3 + $0x340] sm:$0xff] %v1350_v28  ;;  %1520 = vst.msk [vmem:[%s3567_s3 + $0x348] sm:$0xff] %vm1415_vm1, %v1351_v45  ;;  %v1352_v42 = vmul.f32 %v1900_v5, %v1184_v24  ;;  %v1353_v34 = vmul.f32 %v1900_v5, %v1185_v22  ;;  %1921 = vpow2.f32 %v1653_v17  ;;  %v1654_v35 = vmul.f32 -1.442695, %v522_v44  ;;  %v1199_v24 = vld [vmem:[%s3566_s2 + $0x3c8] sm:$0xff]  ;;  %v1200_v5 = vld [vmem:[%s3566_s2 + $0x3d0] sm:$0xff] }
 0x1dc   :  { %v1904_v50 = vpop.eup %1903  ;;  %1923 = vrcp.f32 %v885_v61  ;;  %v886_v56 = vadd.f32 1.0, %v1902_v13  ;;  %v525_v39 = vpop.xlane.xlu1 %524 }
 0x1dd   :  { %v1906_v62 = vpop.eup %1905  ;;  %1521 = vst [vmem:[%s3567_s3 + $0x350] sm:$0xff] %v1352_v42  ;;  %1522 = vst.msk [vmem:[%s3567_s3 + $0x358] sm:$0xff] %vm1415_vm1, %v1353_v34  ;;  %v1354_v11 = vmul.f32 %v1904_v50, %v1186_v54  ;;  %v1355_v18 = vmul.f32 %v1904_v50, %v1187_v7  ;;  %1925 = vpow2.f32 %v1654_v35  ;;  %v1655_v41 = vmul.f32 -1.442695, %v525_v39  ;;  %v1201_v54 = vld [vmem:[%s3566_s2 + $0x3d8] sm:$0xff]  ;;  %v1202_v50 = vld [vmem:[%s3566_s2 + $0x3e0] sm:$0xff] }
 0x1de   :  { %v1908_v4 = vpop.eup %1907  ;;  %1927 = vrcp.f32 %v886_v56  ;;  %v887_v43 = vadd.f32 1.0, %v1906_v62  ;;  %v528_v30 = vpop.xlane.xlu0 %527 }
 0x1df   :  { %v1910_v16 = vpop.eup %1909  ;;  %1523 = vst [vmem:[%s3567_s3 + $0x360] sm:$0xff] %v1354_v11  ;;  %1524 = vst.msk [vmem:[%s3567_s3 + $0x368] sm:$0xff] %vm1415_vm1, %v1355_v18  ;;  %v1356_v47 = vmul.f32 %v1908_v4, %v1188_v31  ;;  %v1357_v57 = vmul.f32 %v1908_v4, %v1189_v37  ;;  %1929 = vpow2.f32 %v1655_v41  ;;  %v1656_v32 = vmul.f32 -1.442695, %v528_v30  ;;  %v1203_v31 = vld [vmem:[%s3566_s2 + $0x3e8] sm:$0xff]  ;;  %v1204_v4 = vld [vmem:[%s3566_s2 + $0x3f0] sm:$0xff] }
 0x1e0   :  { %v1912_v0 = vpop.eup %1911  ;;  %1931 = vrcp.f32 %v887_v43  ;;  %v888_v55 = vadd.f32 1.0, %v1910_v16  ;;  %v531_v33 = vpop.xlane.xlu1 %530 }
 0x1e1   :  { %v1914_v9 = vpop.eup %1913  ;;  %1525 = vst [vmem:[%s3567_s3 + $0x370] sm:$0xff] %v1356_v47  ;;  %1526 = vst.msk [vmem:[%s3567_s3 + $0x378] sm:$0xff] %vm1415_vm1, %v1357_v57  ;;  %v1358_v46 = vmul.f32 %v1912_v0, %v1190_v59  ;;  %v1359_v14 = vmul.f32 %v1912_v0, %v1191_v19  ;;  %1933 = vpow2.f32 %v1656_v32  ;;  %v1657_v15 = vmul.f32 -1.442695, %v531_v33  ;;  %v1205_v59 = vld [vmem:[%s3566_s2 + $0x3f8] sm:$0xff]  ;;  %v1206_v0 = vld [vmem:[%s3566_s2 + $0x400] sm:$0xff] }
 0x1e2   :  { %v1916_v52 = vpop.eup %1915  ;;  %1935 = vrcp.f32 %v888_v55  ;;  %v889_v26 = vadd.f32 1.0, %v1914_v9  ;;  %v534_v3 = vpop.xlane.xlu0 %533 }
 0x1e3   :  { %v1918_v8 = vpop.eup %1917  ;;  %1527 = vst [vmem:[%s3567_s3 + $0x380] sm:$0xff] %v1358_v46  ;;  %1528 = vst.msk [vmem:[%s3567_s3 + $0x388] sm:$0xff] %vm1415_vm1, %v1359_v14  ;;  %v1360_v40 = vmul.f32 %v1916_v52, %v1192_v25  ;;  %v1361_v36 = vmul.f32 %v1916_v52, %v1193_v38  ;;  %1937 = vpow2.f32 %v1657_v15  ;;  %v1658_v6 = vmul.f32 -1.442695, %v534_v3  ;;  %v1207_v25 = vld [vmem:[%s3566_s2 + $0x408] sm:$0xff]  ;;  %v1208_v52 = vld [vmem:[%s3566_s2 + $0x410] sm:$0xff] }
 0x1e4   :  { %v1920_v51 = vpop.eup %1919  ;;  %1939 = vrcp.f32 %v889_v26  ;;  %v890_v63 = vadd.f32 1.0, %v1918_v8  ;;  %v537_v60 = vpop.xlane.xlu1 %536 }
 0x1e5   :  { %v1922_v23 = vpop.eup %1921  ;;  %1529 = vst [vmem:[%s3567_s3 + $0x390] sm:$0xff] %v1360_v40  ;;  %1530 = vst.msk [vmem:[%s3567_s3 + $0x398] sm:$0xff] %vm1415_vm1, %v1361_v36  ;;  %v1362_v2 = vmul.f32 %v1920_v51, %v1194_v20  ;;  %v1363_v27 = vmul.f32 %v1920_v51, %v1195_v53  ;;  %1941 = vpow2.f32 %v1658_v6  ;;  %v1659_v12 = vmul.f32 -1.442695, %v537_v60  ;;  %v1209_v20 = vld [vmem:[%s3566_s2 + $0x418] sm:$0xff]  ;;  %v1210_v51 = vld [vmem:[%s3566_s2 + $0x420] sm:$0xff] }
 0x1e6   :  { %v1924_v29 = vpop.eup %1923  ;;  %1943 = vrcp.f32 %v890_v63  ;;  %v891_v22 = vadd.f32 1.0, %v1922_v23  ;;  %v540_v21 = vpop.xlane.xlu0 %539 }
 0x1e7   :  { %v1926_v1 = vpop.eup %1925  ;;  %1531 = vst [vmem:[%s3567_s3 + $0x3a0] sm:$0xff] %v1362_v2  ;;  %1532 = vst.msk [vmem:[%s3567_s3 + $0x3a8] sm:$0xff] %vm1415_vm1, %v1363_v27  ;;  %v1364_v58 = vmul.f32 %v1924_v29, %v1196_v49  ;;  %v1365_v28 = vmul.f32 %v1924_v29, %v1197_v10  ;;  %1945 = vpow2.f32 %v1659_v12  ;;  %v1660_v45 = vmul.f32 -1.442695, %v540_v21  ;;  %v1211_v49 = vld [vmem:[%s3566_s2 + $0x428] sm:$0xff]  ;;  %v1212_v29 = vld [vmem:[%s3566_s2 + $0x430] sm:$0xff] }
 0x1e8   :  { %v1928_v17 = vpop.eup %1927  ;;  %1947 = vrcp.f32 %v891_v22  ;;  %v892_v7 = vadd.f32 1.0, %v1926_v1  ;;  %v543_v61 = vpop.xlane.xlu1 %542 }
 0x1e9   :  { %v1930_v44 = vpop.eup %1929  ;;  %1533 = vst [vmem:[%s3567_s3 + $0x3b0] sm:$0xff] %v1364_v58  ;;  %1534 = vst.msk [vmem:[%s3567_s3 + $0x3b8] sm:$0xff] %vm1415_vm1, %v1365_v28  ;;  %v1366_v13 = vmul.f32 %v1928_v17, %v1198_v48  ;;  %v1367_v42 = vmul.f32 %v1928_v17, %v1199_v24  ;;  %1949 = vpow2.f32 %v1660_v45  ;;  %v1661_v34 = vmul.f32 -1.442695, %v543_v61  ;;  %v1213_v48 = vld [vmem:[%s3566_s2 + $0x438] sm:$0xff]  ;;  %v1214_v17 = vld [vmem:[%s3566_s2 + $0x440] sm:$0xff] }
 0x1ea   :  { %v1932_v35 = vpop.eup %1931  ;;  %1951 = vrcp.f32 %v892_v7  ;;  %v893_v37 = vadd.f32 1.0, %v1930_v44  ;;  %v546_v56 = vpop.xlane.xlu0 %545 }
 0x1eb   :  { %v1934_v39 = vpop.eup %1933  ;;  %1535 = vst [vmem:[%s3567_s3 + $0x3c0] sm:$0xff] %v1366_v13  ;;  %1536 = vst.msk [vmem:[%s3567_s3 + $0x3c8] sm:$0xff] %vm1415_vm1, %v1367_v42  ;;  %v1368_v62 = vmul.f32 %v1932_v35, %v1200_v5  ;;  %v1369_v11 = vmul.f32 %v1932_v35, %v1201_v54  ;;  %1953 = vpow2.f32 %v1661_v34  ;;  %v1662_v18 = vmul.f32 -1.442695, %v546_v56  ;;  %v1215_v5 = vld [vmem:[%s3566_s2 + $0x448] sm:$0xff]  ;;  %v1216_v35 = vld [vmem:[%s3566_s2 + $0x450] sm:$0xff] }
 0x1ec   :  { %v1936_v41 = vpop.eup %1935  ;;  %1955 = vrcp.f32 %v893_v37  ;;  %v894_v19 = vadd.f32 1.0, %v1934_v39  ;;  %v549_v43 = vpop.xlane.xlu1 %548 }
 0x1ed   :  { %v1938_v30 = vpop.eup %1937  ;;  %1537 = vst [vmem:[%s3567_s3 + $0x3d0] sm:$0xff] %v1368_v62  ;;  %1538 = vst.msk [vmem:[%s3567_s3 + $0x3d8] sm:$0xff] %vm1415_vm1, %v1369_v11  ;;  %v1370_v16 = vmul.f32 %v1936_v41, %v1202_v50  ;;  %v1371_v47 = vmul.f32 %v1936_v41, %v1203_v31  ;;  %1957 = vpow2.f32 %v1662_v18  ;;  %v1663_v57 = vmul.f32 -1.442695, %v549_v43  ;;  %v1217_v50 = vld [vmem:[%s3566_s2 + $0x458] sm:$0xff]  ;;  %v1218_v41 = vld [vmem:[%s3566_s2 + $0x460] sm:$0xff] }
 0x1ee   :  { %v1940_v32 = vpop.eup %1939  ;;  %1959 = vrcp.f32 %v894_v19  ;;  %v895_v38 = vadd.f32 1.0, %v1938_v30  ;;  %v552_v55 = vpop.xlane.xlu0 %551 }
 0x1ef   :  { %v1942_v33 = vpop.eup %1941  ;;  %1539 = vst [vmem:[%s3567_s3 + $0x3e0] sm:$0xff] %v1370_v16  ;;  %1540 = vst.msk [vmem:[%s3567_s3 + $0x3e8] sm:$0xff] %vm1415_vm1, %v1371_v47  ;;  %v1372_v9 = vmul.f32 %v1940_v32, %v1204_v4  ;;  %v1373_v46 = vmul.f32 %v1940_v32, %v1205_v59  ;;  %1961 = vpow2.f32 %v1663_v57  ;;  %v1664_v14 = vmul.f32 -1.442695, %v552_v55  ;;  %v1219_v4 = vld [vmem:[%s3566_s2 + $0x468] sm:$0xff]  ;;  %v1220_v32 = vld [vmem:[%s3566_s2 + $0x470] sm:$0xff] }
 0x1f0   :  { %v1944_v15 = vpop.eup %1943  ;;  %1963 = vrcp.f32 %v895_v38  ;;  %v896_v53 = vadd.f32 1.0, %v1942_v33  ;;  %v555_v26 = vpop.xlane.xlu1 %554 }
 0x1f1   :  { %v1946_v3 = vpop.eup %1945  ;;  %1541 = vst [vmem:[%s3567_s3 + $0x3f0] sm:$0xff] %v1372_v9  ;;  %1542 = vst.msk [vmem:[%s3567_s3 + $0x3f8] sm:$0xff] %vm1415_vm1, %v1373_v46  ;;  %v1374_v8 = vmul.f32 %v1944_v15, %v1206_v0  ;;  %v1375_v40 = vmul.f32 %v1944_v15, %v1207_v25  ;;  %1965 = vpow2.f32 %v1664_v14  ;;  %v1665_v36 = vmul.f32 -1.442695, %v555_v26  ;;  %v1221_v0 = vld [vmem:[%s3566_s2 + $0x478] sm:$0xff]  ;;  %v1222_v15 = vld [vmem:[%s3566_s2 + $0x480] sm:$0xff] }
 0x1f2   :  { %v1948_v6 = vpop.eup %1947  ;;  %1967 = vrcp.f32 %v896_v53  ;;  %v897_v10 = vadd.f32 1.0, %v1946_v3  ;;  %v558_v63 = vpop.xlane.xlu0 %557 }
 0x1f3   :  { %v1950_v60 = vpop.eup %1949  ;;  %1543 = vst [vmem:[%s3567_s3 + $0x400] sm:$0xff] %v1374_v8  ;;  %1544 = vst.msk [vmem:[%s3567_s3 + $0x408] sm:$0xff] %vm1415_vm1, %v1375_v40  ;;  %v1376_v23 = vmul.f32 %v1948_v6, %v1208_v52  ;;  %v1377_v2 = vmul.f32 %v1948_v6, %v1209_v20  ;;  %1969 = vpow2.f32 %v1665_v36  ;;  %v1666_v27 = vmul.f32 -1.442695, %v558_v63  ;;  %v1223_v52 = vld [vmem:[%s3566_s2 + $0x488] sm:$0xff]  ;;  %v1224_v40 = vld [vmem:[%s3566_s2 + $0x490] sm:$0xff] }
 0x1f4   :  { %v1952_v12 = vpop.eup %1951  ;;  %1971 = vrcp.f32 %v897_v10  ;;  %v898_v24 = vadd.f32 1.0, %v1950_v60  ;;  %v561_v22 = vpop.xlane.xlu1 %560  ;;  %v1225_v36 = vld [vmem:[%s3566_s2 + $0x498] sm:$0xff]  ;;  %v1226_v60 = vld [vmem:[%s3566_s2 + $0x4a0] sm:$0xff] }
 0x1f5   :  { %v1954_v21 = vpop.eup %1953  ;;  %1545 = vst [vmem:[%s3567_s3 + $0x410] sm:$0xff] %v1376_v23  ;;  %1546 = vst.msk [vmem:[%s3567_s3 + $0x418] sm:$0xff] %vm1415_vm1, %v1377_v2  ;;  %v1378_v1 = vmul.f32 %v1952_v12, %v1210_v51  ;;  %v1379_v58 = vmul.f32 %v1952_v12, %v1211_v49  ;;  %1973 = vpow2.f32 %v1666_v27  ;;  %v1667_v28 = vmul.f32 -1.442695, %v561_v22  ;;  %v1227_v23 = vld [vmem:[%s3566_s2 + $0x4a8] sm:$0xff]  ;;  %v1229_v22 = vld [vmem:[%s3566_s2 + $0x4b8] sm:$0xff] }
 0x1f6   :  { %v1956_v45 = vpop.eup %1955  ;;  %1975 = vrcp.f32 %v898_v24  ;;  %v899_v54 = vadd.f32 1.0, %v1954_v21  ;;  %v564_v7 = vpop.xlane.xlu0 %563  ;;  %v1228_v24 = vld [vmem:[%s3566_s2 + $0x4b0] sm:$0xff] }
 0x1f7   :  { %v1958_v61 = vpop.eup %1957  ;;  %1547 = vst [vmem:[%s3567_s3 + $0x420] sm:$0xff] %v1378_v1  ;;  %1548 = vst.msk [vmem:[%s3567_s3 + $0x428] sm:$0xff] %vm1415_vm1, %v1379_v58  ;;  %v1380_v44 = vmul.f32 %v1956_v45, %v1212_v29  ;;  %v1381_v13 = vmul.f32 %v1956_v45, %v1213_v48  ;;  %1977 = vpow2.f32 %v1667_v28  ;;  %v1668_v42 = vmul.f32 -1.442695, %v564_v7 }
 0x1f8   :  { %v1960_v34 = vpop.eup %1959  ;;  %1979 = vrcp.f32 %v899_v54  ;;  %v900_v31 = vadd.f32 1.0, %v1958_v61  ;;  %v567_v37 = vpop.xlane.xlu1 %566 }
 0x1f9   :  { %v1962_v56 = vpop.eup %1961  ;;  %1549 = vst [vmem:[%s3567_s3 + $0x430] sm:$0xff] %v1380_v44  ;;  %1550 = vst.msk [vmem:[%s3567_s3 + $0x438] sm:$0xff] %vm1415_vm1, %v1381_v13  ;;  %v1382_v39 = vmul.f32 %v1960_v34, %v1214_v17  ;;  %v1383_v62 = vmul.f32 %v1960_v34, %v1215_v5  ;;  %1981 = vpow2.f32 %v1668_v42  ;;  %v1669_v11 = vmul.f32 -1.442695, %v567_v37  ;;  %v1230_v17 = vld [vmem:[%s3566_s2 + $0x4c0] sm:$0xff]  ;;  %v1231_v5 = vld [vmem:[%s3566_s2 + $0x4c8] sm:$0xff] }
 0x1fa   :  { %v1964_v18 = vpop.eup %1963  ;;  %1983 = vrcp.f32 %v900_v31  ;;  %v901_v59 = vadd.f32 1.0, %v1962_v56  ;;  %v570_v19 = vpop.xlane.xlu0 %569  ;;  %v1232_v42 = vld [vmem:[%s3566_s2 + $0x4d0] sm:$0xff]  ;;  %v1233_v34 = vld [vmem:[%s3566_s2 + $0x4d8] sm:$0xff] }
 0x1fb   :  { %v1966_v43 = vpop.eup %1965  ;;  %1551 = vst [vmem:[%s3567_s3 + $0x440] sm:$0xff] %v1382_v39  ;;  %1552 = vst.msk [vmem:[%s3567_s3 + $0x448] sm:$0xff] %vm1415_vm1, %v1383_v62  ;;  %v1384_v30 = vmul.f32 %v1964_v18, %v1216_v35  ;;  %v1385_v16 = vmul.f32 %v1964_v18, %v1217_v50  ;;  %1985 = vpow2.f32 %v1669_v11  ;;  %v1670_v47 = vmul.f32 -1.442695, %v570_v19  ;;  %v1234_v39 = vld [vmem:[%s3566_s2 + $0x4e0] sm:$0xff]  ;;  %v1235_v62 = vld [vmem:[%s3566_s2 + $0x4e8] sm:$0xff] }
 0x1fc   :  { %v1968_v57 = vpop.eup %1967  ;;  %1987 = vrcp.f32 %v901_v59  ;;  %v902_v25 = vadd.f32 1.0, %v1966_v43  ;;  %v573_v38 = vpop.xlane.xlu1 %572  ;;  %v1236_v59 = vld [vmem:[%s3566_s2 + $0x4f0] sm:$0xff]  ;;  %v1237_v19 = vld [vmem:[%s3566_s2 + $0x4f8] sm:$0xff] }
 0x1fd   :  { %v1970_v55 = vpop.eup %1969  ;;  %1553 = vst [vmem:[%s3567_s3 + $0x450] sm:$0xff] %v1384_v30  ;;  %1554 = vst.msk [vmem:[%s3567_s3 + $0x458] sm:$0xff] %vm1415_vm1, %v1385_v16  ;;  %v1386_v33 = vmul.f32 %v1968_v57, %v1218_v41  ;;  %v1387_v9 = vmul.f32 %v1968_v57, %v1219_v4  ;;  %1989 = vpow2.f32 %v1670_v47  ;;  %v1671_v46 = vmul.f32 -1.442695, %v573_v38  ;;  %v1238_v47 = vld [vmem:[%s3566_s2 + $0x500] sm:$0xff]  ;;  %v1239_v57 = vld [vmem:[%s3566_s2 + $0x508] sm:$0xff] }
 0x1fe   :  { %v1972_v14 = vpop.eup %1971  ;;  %1991 = vrcp.f32 %v902_v25  ;;  %v903_v20 = vadd.f32 1.0, %v1970_v55  ;;  %v1240_v38 = vld [vmem:[%s3566_s2 + $0x510] sm:$0xff]  ;;  %v1241_v55 = vld [vmem:[%s3566_s2 + $0x518] sm:$0xff] }
 0x1ff   :  { %v1974_v53 = vpop.eup %1973  ;;  %1555 = vst [vmem:[%s3567_s3 + $0x460] sm:$0xff] %v1386_v33  ;;  %1556 = vst.msk [vmem:[%s3567_s3 + $0x468] sm:$0xff] %vm1415_vm1, %v1387_v9  ;;  %v1388_v26 = vmul.f32 %v1972_v14, %v1220_v32  ;;  %v1389_v3 = vmul.f32 %v1972_v14, %v1221_v0  ;;  %1993 = vpow2.f32 %v1671_v46  ;;  %v1242_v14 = vld [vmem:[%s3566_s2 + $0x520] sm:$0xff] }
 0x200   :  { %v1976_v8 = vpop.eup %1975  ;;  %1995 = vrcp.f32 %v903_v20  ;;  %v904_v6 = vadd.f32 1.0, %v1974_v53 }
 0x201   :  { %v1978_v51 = vpop.eup %1977  ;;  %1557 = vst [vmem:[%s3567_s3 + $0x470] sm:$0xff] %v1388_v26  ;;  %1558 = vst.msk [vmem:[%s3567_s3 + $0x478] sm:$0xff] %vm1415_vm1, %v1389_v3  ;;  %v1390_v49 = vmul.f32 %v1976_v8, %v1222_v15  ;;  %v1391_v10 = vmul.f32 %v1976_v8, %v1223_v52  ;;  %v1243_v15 = vld [vmem:[%s3566_s2 + $0x528] sm:$0xff]  ;;  %v1244_v26 = vld [vmem:[%s3566_s2 + $0x530] sm:$0xff] }
 0x202   :  { %v1980_v63 = vpop.eup %1979  ;;  %1997 = vrcp.f32 %v904_v6  ;;  %v905_v2 = vadd.f32 1.0, %v1978_v51  ;;  %v1245_v3 = vld [vmem:[%s3566_s2 + $0x538] sm:$0xff] }
 0x203   :  { %v1982_v27 = vpop.eup %1981  ;;  %1559 = vst [vmem:[%s3567_s3 + $0x480] sm:$0xff] %v1390_v49  ;;  %1560 = vst.msk [vmem:[%s3567_s3 + $0x488] sm:$0xff] %vm1415_vm1, %v1391_v10  ;;  %v1392_v12 = vmul.f32 %v1980_v63, %v1224_v40  ;;  %v1393_v29 = vmul.f32 %v1980_v63, %v1225_v36 }
 0x204   :  { %v1984_v48 = vpop.eup %1983  ;;  %1999 = vrcp.f32 %v905_v2  ;;  %v906_v21 = vadd.f32 1.0, %v1982_v27 }
 0x205   :  { %v1986_v1 = vpop.eup %1985  ;;  %1561 = vst [vmem:[%s3567_s3 + $0x490] sm:$0xff] %v1392_v12  ;;  %1562 = vst.msk [vmem:[%s3567_s3 + $0x498] sm:$0xff] %vm1415_vm1, %v1393_v29  ;;  %v1394_v58 = vmul.f32 %v1984_v48, %v1226_v60  ;;  %v1395_v28 = vmul.f32 %v1984_v48, %v1227_v23 }
 0x206   :  { %v1988_v45 = vpop.eup %1987  ;;  %2001 = vrcp.f32 %v906_v21  ;;  %v907_v54 = vadd.f32 1.0, %v1986_v1 }
 0x207   :  { %v1990_v7 = vpop.eup %1989  ;;  %1563 = vst [vmem:[%s3567_s3 + $0x4a0] sm:$0xff] %v1394_v58  ;;  %1564 = vst.msk [vmem:[%s3567_s3 + $0x4a8] sm:$0xff] %vm1415_vm1, %v1395_v28  ;;  %v1396_v61 = vmul.f32 %v1988_v45, %v1228_v24  ;;  %v1397_v44 = vmul.f32 %v1988_v45, %v1229_v22 }
 0x208   :  { %v1992_v13 = vpop.eup %1991  ;;  %2003 = vrcp.f32 %v907_v54  ;;  %v908_v35 = vadd.f32 1.0, %v1990_v7 }
 0x209   :  { %v1994_v50 = vpop.eup %1993  ;;  %1565 = vst [vmem:[%s3567_s3 + $0x4b0] sm:$0xff] %v1396_v61  ;;  %1566 = vst.msk [vmem:[%s3567_s3 + $0x4b8] sm:$0xff] %vm1415_vm1, %v1397_v44  ;;  %v1398_v31 = vmul.f32 %v1992_v13, %v1230_v17  ;;  %v1399_v37 = vmul.f32 %v1992_v13, %v1231_v5 }
 0x20a   :  { %v1996_v56 = vpop.eup %1995  ;;  %2005 = vrcp.f32 %v908_v35  ;;  %v909_v11 = vadd.f32 1.0, %v1994_v50 }
 0x20b   :  { %1567 = vst [vmem:[%s3567_s3 + $0x4c0] sm:$0xff] %v1398_v31  ;;  %1568 = vst.msk [vmem:[%s3567_s3 + $0x4c8] sm:$0xff] %vm1415_vm1, %v1399_v37  ;;  %v1400_v18 = vmul.f32 %v1996_v56, %v1232_v42  ;;  %v1401_v41 = vmul.f32 %v1996_v56, %v1233_v34 }
 0x20c   :  { %v1998_v4 = vpop.eup %1997  ;;  %2007 = vrcp.f32 %v909_v11 }
 0x20d   :  { %1569 = vst [vmem:[%s3567_s3 + $0x4d0] sm:$0xff] %v1400_v18  ;;  %1570 = vst.msk [vmem:[%s3567_s3 + $0x4d8] sm:$0xff] %vm1415_vm1, %v1401_v41  ;;  %v1402_v43 = vmul.f32 %v1998_v4, %v1234_v39  ;;  %v1403_v30 = vmul.f32 %v1998_v4, %v1235_v62 }
 0x20e   :  { %v2000_v16 = vpop.eup %1999 }
 0x20f   :  { %1571 = vst [vmem:[%s3567_s3 + $0x4e0] sm:$0xff] %v1402_v43  ;;  %1572 = vst.msk [vmem:[%s3567_s3 + $0x4e8] sm:$0xff] %vm1415_vm1, %v1403_v30  ;;  %v1404_v32 = vmul.f32 %v2000_v16, %v1236_v59  ;;  %v1405_v0 = vmul.f32 %v2000_v16, %v1237_v19 }
 0x210   :  { %v2002_v25 = vpop.eup %2001 }
 0x211   :  { %1573 = vst [vmem:[%s3567_s3 + $0x4f0] sm:$0xff] %v1404_v32  ;;  %1574 = vst.msk [vmem:[%s3567_s3 + $0x4f8] sm:$0xff] %vm1415_vm1, %v1405_v0  ;;  %v1406_v33 = vmul.f32 %v2002_v25, %v1238_v47  ;;  %v1407_v9 = vmul.f32 %v2002_v25, %v1239_v57 }
 0x212   :  { %v2004_v46 = vpop.eup %2003 }
 0x213   :  { %1575 = vst [vmem:[%s3567_s3 + $0x500] sm:$0xff] %v1406_v33  ;;  %1576 = vst.msk [vmem:[%s3567_s3 + $0x508] sm:$0xff] %vm1415_vm1, %v1407_v9  ;;  %v1408_v52 = vmul.f32 %v2004_v46, %v1240_v38  ;;  %v1409_v20 = vmul.f32 %v2004_v46, %v1241_v55 }
 0x214   :  { %v2006_v53 = vpop.eup %2005 }
 0x215   :  { %1577 = vst [vmem:[%s3567_s3 + $0x510] sm:$0xff] %v1408_v52  ;;  %1578 = vst.msk [vmem:[%s3567_s3 + $0x518] sm:$0xff] %vm1415_vm1, %v1409_v20  ;;  %v1410_v8 = vmul.f32 %v2006_v53, %v1242_v14  ;;  %v1411_v40 = vmul.f32 %v2006_v53, %v1243_v15 }
 0x216   :  { %v2008_v36 = vpop.eup %2007 }
 0x217   :  { %1579 = vst [vmem:[%s3567_s3 + $0x520] sm:$0xff] %v1410_v8  ;;  %1580 = vst.msk [vmem:[%s3567_s3 + $0x528] sm:$0xff] %vm1415_vm1, %v1411_v40  ;;  %v1412_v6 = vmul.f32 %v2008_v36, %v1244_v26  ;;  %v1413_v51 = vmul.f32 %v2008_v36, %v1245_v3 }
 0x219   :  { %1581 = vst [vmem:[%s3567_s3 + $0x530] sm:$0xff] %v1412_v6  ;;  %1582 = vst.msk [vmem:[%s3567_s3 + $0x538] sm:$0xff] %vm1415_vm1, %v1413_v51 }

</bundles_post_ra>
